<compile_context>
chip_gen: v5e
topology: v5e:2x2
jax: 0.10.0
libtpu: 0.0.40
codegen_flags: <defaults>
</compile_context>

<pallas_src>
import functools

import jax
import jax.numpy as jnp
from jax.experimental import pallas as pl
from jax.experimental.pallas import tpu as pltpu


def _conv_relu_kernel(x_ref, w_ref, b_ref, o_ref, *, k, s, t_oh, ow, c_out):
    # x_ref: (1, Hp, Wp, C_in)    f32, full padded image (resident across row tiles)
    # w_ref: (k*k, C_in, C_out)   bf16, grid-constant
    # b_ref: (1, C_out)           f32,  grid-constant
    # o_ref: (1, t_oh, OW, C_out) f32
    r = pl.program_id(1)
    row0 = r * (t_oh * s)          # first padded-input row of this output tile
    m = t_oh * ow

    acc = jnp.zeros((m, c_out), jnp.float32)
    for kh in range(k):            # statically unrolled: k*k small MXU dots
        for kw in range(k):
            if s == 1:
                rows = pl.ds(row0 + kh, t_oh)
                cols = pl.ds(kw, ow)
            else:
                rows = pl.ds(row0 + kh, t_oh, s)
                cols = pl.ds(kw, ow, s)
            patch = x_ref[0, rows, cols, :]                      # (t_oh, OW, C_in)
            patch = patch.reshape(m, patch.shape[-1]).astype(jnp.bfloat16)
            acc = acc + jnp.dot(patch, w_ref[kh * k + kw],
                                preferred_element_type=jnp.float32)

    out = jnp.maximum(acc + b_ref[...], 0.0)                     # bias + ReLU in f32
    o_ref[0] = out.reshape(t_oh, ow, c_out).astype(o_ref.dtype)


def _pick_row_tile(oh, ow, batch, target_rows=1024):
    """Largest divisor of OH whose tile (t_oh*OW GEMM rows) stays under
    target_rows; shrink a little if that would leave <4 grid steps (v7x has
    2 TensorCores) while keeping >=256 rows per step."""
    t_oh = 1
    for d in range(1, oh + 1):
        if oh % d == 0 and d * ow <= target_rows:
            t_oh = d
    while (batch * (oh // t_oh) < 4 and t_oh % 2 == 0
           and (t_oh // 2) * ow >= 256):
        t_oh //= 2
    return t_oh


@functools.partial(jax.jit, static_argnames=("k", "s", "p"))
def conv_block_forward(x, weight, bias, *, k, s, p):
    """ConvBlock forward: Conv2d(k,k, stride s, pad p) + ReLU.

    x:      (B, C_in, H, W)     float32, NCHW (PyTorch contract)
    weight: (C_out, C_in, k, k) float32
    bias:   (C_out,)            float32
    returns (B, C_out, OH, OW)  float32, NCHW
    """
    B, C_in, H, W = x.shape
    C_out = weight.shape[0]
    OH = (H + 2 * p - k) // s + 1
    OW = (W + 2 * p - k) // s + 1
    Hp, Wp = H + 2 * p, W + 2 * p

    # Single fused HBM pass of input prep: NCHW -> NHWC + spatial zero-pad.
    xp = jnp.pad(jnp.transpose(x, (0, 2, 3, 1)),
                 ((0, 0), (p, p), (p, p), (0, 0)))

    # Weight as (k*k, C_in, C_out) bf16 (same (kh,kw,c) order the kernel uses).
    w_kkio = jnp.transpose(weight, (2, 3, 1, 0)).reshape(k * k, C_in, C_out)
    w_kkio = w_kkio.astype(jnp.bfloat16)
    b_mat = bias.reshape(1, C_out).astype(jnp.float32)

    t_oh = _pick_row_tile(OH, OW, B)
    grid = (B, OH // t_oh)

    # Rough double-buffered per-step VMEM footprint -> explicit limit
    # (matters on v5e, whose scoped default is 16 MiB, once tiles get big).
    est = 2 * (Hp * Wp * C_in * 4 + k * k * C_in * C_out * 2 + C_out * 4
               + t_oh * OW * C_out * 4)
    vmem_limit = int(min(max(2 * est, 8 * 1024 * 1024), 32 * 1024 * 1024))

    kernel = functools.partial(_conv_relu_kernel, k=k, s=s, t_oh=t_oh,
                               ow=OW, c_out=C_out)

    out_nhwc = pl.pallas_call(
        kernel,
        out_shape=jax.ShapeDtypeStruct((B, OH, OW, C_out), jnp.float32),
        grid_spec=pltpu.PrefetchScalarGridSpec(
            num_scalar_prefetch=0,
            grid=grid,
            in_specs=[
                # Full padded image per batch element; block index is constant
                # along the row-tile axis so it stays resident across row tiles.
                pl.BlockSpec((1, Hp, Wp, C_in), lambda b, r: (b, 0, 0, 0)),
                # Tiny grid-constant weights / bias.
                pl.BlockSpec((k * k, C_in, C_out), lambda b, r: (0, 0, 0)),
                pl.BlockSpec((1, C_out), lambda b, r: (0, 0)),
            ],
            out_specs=pl.BlockSpec((1, t_oh, OW, C_out),
                                   lambda b, r: (b, r, 0, 0)),
        ),
        compiler_params=pltpu.CompilerParams(
            dimension_semantics=("parallel", "parallel"),
            vmem_limit_bytes=vmem_limit),
    )(xp, w_kkio, b_mat)

    # PyTorch contract is NCHW; a full NHWC pipeline would return out_nhwc.
    return jnp.transpose(out_nhwc, (0, 3, 1, 2))


if __name__ == "__main__":
    # Shapes consistent with ConvBlock(in_fts=4, out_fts=8, k=3, s=1, p=1).
    B, C_in, H, W = 2, 4, 16, 16
    C_out, k, s, p = 8, 3, 1, 1

    key = jax.random.PRNGKey(0)
    kx, kw_, kb = jax.random.split(key, 3)
    x = jax.random.normal(kx, (B, C_in, H, W), dtype=jnp.float32)
    weight = jax.random.normal(kw_, (C_out, C_in, k, k), dtype=jnp.float32) * 0.1
    bias = jax.random.normal(kb, (C_out,), dtype=jnp.float32) * 0.1

    out = conv_block_forward(x, weight, bias, k=k, s=s, p=p)
    out = jax.block_until_ready(out)

    # Reference with the same bf16 input rounding as the kernel's MXU path
    # (f32 accumulation), so the tolerance can stay tight.
    x_r = x.astype(jnp.bfloat16).astype(jnp.float32)
    w_r = weight.astype(jnp.bfloat16).astype(jnp.float32)
    ref = jax.lax.conv_general_dilated(
        x_r, w_r, window_strides=(s, s), padding=[(p, p), (p, p)],
        dimension_numbers=("NCHW", "OIHW", "NCHW"))
    ref = jnp.maximum(ref + bias.reshape(1, C_out, 1, 1), 0.0)

    assert out.shape == (B, C_out, H, W)
    err = float(jnp.max(jnp.abs(out - ref)))
    assert err < 5e-3, f"mismatch vs reference conv: max abs err {err}"

    print("KERNEL_OK")
</pallas_src>

<mosaic_0001>
module attributes {stable_mosaic.version = 11 : i64} {
  func.func @_conv_relu_kernel(%arg0: i32, %arg1: i32, %arg2: memref<1x18x18x4xf32, #tpu.memory_space<vmem>>, %arg3: memref<9x4x8xbf16, #tpu.memory_space<vmem>>, %arg4: memref<1x8xf32, #tpu.memory_space<vmem>>, %arg5: memref<1x16x16x8xf32, #tpu.memory_space<vmem>>) attributes {dimension_semantics = [#tpu.dimension_semantics<parallel>, #tpu.dimension_semantics<parallel>], iteration_bounds = array<i64: 2, 1>, scalar_prefetch = 0 : i64, scratch_operands = 0 : i64, tpu.core_type = #tpu.core_type<tc>, window_params = [{transform_indices = @transform_0, window_bounds = array<i64: 1, 18, 18, 4>}, {pipeline_mode = #tpu.pipeline_mode<synchronous>, transform_indices = @transform_1, window_bounds = array<i64: 9, 4, 8>}, {pipeline_mode = #tpu.pipeline_mode<synchronous>, transform_indices = @transform_2, window_bounds = array<i64: 1, 8>}, {transform_indices = @transform_3, window_bounds = array<i64: 1, 16, 16, 8>}]} {
    %c16_i32 = arith.constant 16 : i32
    %0 = arith.muli %arg1, %c16_i32 : i32
    %cst = arith.constant 0.000000e+00 : f32
    %1 = vector.broadcast %cst : f32 to vector<256x8xf32>
    %c0_i32 = arith.constant 0 : i32
    %2 = arith.addi %0, %c0_i32 : i32
    %c0 = arith.constant 0 : index
    %3 = arith.index_cast %2 : i32 to index
    %c0_0 = arith.constant 0 : index
    %c0_1 = arith.constant 0 : index
    %4 = vector.load %arg2[%c0, %3, %c0_0, %c0_1] : memref<1x18x18x4xf32, #tpu.memory_space<vmem>>, vector<1x16x16x4xf32>
    %5 = vector.shape_cast %4 : vector<1x16x16x4xf32> to vector<16x16x4xf32>
    %6 = vector.shape_cast %5 : vector<16x16x4xf32> to vector<256x4xf32>
    %7 = arith.truncf %6 : vector<256x4xf32> to vector<256x4xbf16>
    %c0_2 = arith.constant 0 : index
    %c0_3 = arith.constant 0 : index
    %c0_4 = arith.constant 0 : index
    %8 = vector.load %arg3[%c0_2, %c0_3, %c0_4] : memref<9x4x8xbf16, #tpu.memory_space<vmem>>, vector<1x4x8xbf16>
    %9 = vector.shape_cast %8 : vector<1x4x8xbf16> to vector<4x8xbf16>
    %cst_5 = arith.constant dense<0.000000e+00> : vector<256x8xf32>
    %10 = tpu.matmul %7, %9, %cst_5 {dimension_numbers = #tpu.dot_dimension_numbers<[1], [0], [0], [1], [0, 0, 1, 1], [], []>} : vector<256x4xbf16>, vector<4x8xbf16>, vector<256x8xf32> -> vector<256x8xf32>
    %11 = arith.addf %1, %10 : vector<256x8xf32>
    %c0_i32_6 = arith.constant 0 : i32
    %12 = arith.addi %0, %c0_i32_6 : i32
    %c0_7 = arith.constant 0 : index
    %13 = arith.index_cast %12 : i32 to index
    %c1 = arith.constant 1 : index
    %c0_8 = arith.constant 0 : index
    %14 = vector.load %arg2[%c0_7, %13, %c1, %c0_8] : memref<1x18x18x4xf32, #tpu.memory_space<vmem>>, vector<1x16x16x4xf32>
    %15 = vector.shape_cast %14 : vector<1x16x16x4xf32> to vector<16x16x4xf32>
    %16 = vector.shape_cast %15 : vector<16x16x4xf32> to vector<256x4xf32>
    %17 = arith.truncf %16 : vector<256x4xf32> to vector<256x4xbf16>
    %c1_9 = arith.constant 1 : index
    %c0_10 = arith.constant 0 : index
    %c0_11 = arith.constant 0 : index
    %18 = vector.load %arg3[%c1_9, %c0_10, %c0_11] : memref<9x4x8xbf16, #tpu.memory_space<vmem>>, vector<1x4x8xbf16>
    %19 = vector.shape_cast %18 : vector<1x4x8xbf16> to vector<4x8xbf16>
    %cst_12 = arith.constant dense<0.000000e+00> : vector<256x8xf32>
    %20 = tpu.matmul %17, %19, %cst_12 {dimension_numbers = #tpu.dot_dimension_numbers<[1], [0], [0], [1], [0, 0, 1, 1], [], []>} : vector<256x4xbf16>, vector<4x8xbf16>, vector<256x8xf32> -> vector<256x8xf32>
    %21 = arith.addf %11, %20 : vector<256x8xf32>
    %c0_i32_13 = arith.constant 0 : i32
    %22 = arith.addi %0, %c0_i32_13 : i32
    %c0_14 = arith.constant 0 : index
    %23 = arith.index_cast %22 : i32 to index
    %c2 = arith.constant 2 : index
    %c0_15 = arith.constant 0 : index
    %24 = vector.load %arg2[%c0_14, %23, %c2, %c0_15] : memref<1x18x18x4xf32, #tpu.memory_space<vmem>>, vector<1x16x16x4xf32>
    %25 = vector.shape_cast %24 : vector<1x16x16x4xf32> to vector<16x16x4xf32>
    %26 = vector.shape_cast %25 : vector<16x16x4xf32> to vector<256x4xf32>
    %27 = arith.truncf %26 : vector<256x4xf32> to vector<256x4xbf16>
    %c2_16 = arith.constant 2 : index
    %c0_17 = arith.constant 0 : index
    %c0_18 = arith.constant 0 : index
    %28 = vector.load %arg3[%c2_16, %c0_17, %c0_18] : memref<9x4x8xbf16, #tpu.memory_space<vmem>>, vector<1x4x8xbf16>
    %29 = vector.shape_cast %28 : vector<1x4x8xbf16> to vector<4x8xbf16>
    %cst_19 = arith.constant dense<0.000000e+00> : vector<256x8xf32>
    %30 = tpu.matmul %27, %29, %cst_19 {dimension_numbers = #tpu.dot_dimension_numbers<[1], [0], [0], [1], [0, 0, 1, 1], [], []>} : vector<256x4xbf16>, vector<4x8xbf16>, vector<256x8xf32> -> vector<256x8xf32>
    %31 = arith.addf %21, %30 : vector<256x8xf32>
    %c1_i32 = arith.constant 1 : i32
    %32 = arith.addi %0, %c1_i32 : i32
    %c0_20 = arith.constant 0 : index
    %33 = arith.index_cast %32 : i32 to index
    %c0_21 = arith.constant 0 : index
    %c0_22 = arith.constant 0 : index
    %34 = vector.load %arg2[%c0_20, %33, %c0_21, %c0_22] : memref<1x18x18x4xf32, #tpu.memory_space<vmem>>, vector<1x16x16x4xf32>
    %35 = vector.shape_cast %34 : vector<1x16x16x4xf32> to vector<16x16x4xf32>
    %36 = vector.shape_cast %35 : vector<16x16x4xf32> to vector<256x4xf32>
    %37 = arith.truncf %36 : vector<256x4xf32> to vector<256x4xbf16>
    %c3 = arith.constant 3 : index
    %c0_23 = arith.constant 0 : index
    %c0_24 = arith.constant 0 : index
    %38 = vector.load %arg3[%c3, %c0_23, %c0_24] : memref<9x4x8xbf16, #tpu.memory_space<vmem>>, vector<1x4x8xbf16>
    %39 = vector.shape_cast %38 : vector<1x4x8xbf16> to vector<4x8xbf16>
    %cst_25 = arith.constant dense<0.000000e+00> : vector<256x8xf32>
    %40 = tpu.matmul %37, %39, %cst_25 {dimension_numbers = #tpu.dot_dimension_numbers<[1], [0], [0], [1], [0, 0, 1, 1], [], []>} : vector<256x4xbf16>, vector<4x8xbf16>, vector<256x8xf32> -> vector<256x8xf32>
    %41 = arith.addf %31, %40 : vector<256x8xf32>
    %c1_i32_26 = arith.constant 1 : i32
    %42 = arith.addi %0, %c1_i32_26 : i32
    %c0_27 = arith.constant 0 : index
    %43 = arith.index_cast %42 : i32 to index
    %c1_28 = arith.constant 1 : index
    %c0_29 = arith.constant 0 : index
    %44 = vector.load %arg2[%c0_27, %43, %c1_28, %c0_29] : memref<1x18x18x4xf32, #tpu.memory_space<vmem>>, vector<1x16x16x4xf32>
    %45 = vector.shape_cast %44 : vector<1x16x16x4xf32> to vector<16x16x4xf32>
    %46 = vector.shape_cast %45 : vector<16x16x4xf32> to vector<256x4xf32>
    %47 = arith.truncf %46 : vector<256x4xf32> to vector<256x4xbf16>
    %c4 = arith.constant 4 : index
    %c0_30 = arith.constant 0 : index
    %c0_31 = arith.constant 0 : index
    %48 = vector.load %arg3[%c4, %c0_30, %c0_31] : memref<9x4x8xbf16, #tpu.memory_space<vmem>>, vector<1x4x8xbf16>
    %49 = vector.shape_cast %48 : vector<1x4x8xbf16> to vector<4x8xbf16>
    %cst_32 = arith.constant dense<0.000000e+00> : vector<256x8xf32>
    %50 = tpu.matmul %47, %49, %cst_32 {dimension_numbers = #tpu.dot_dimension_numbers<[1], [0], [0], [1], [0, 0, 1, 1], [], []>} : vector<256x4xbf16>, vector<4x8xbf16>, vector<256x8xf32> -> vector<256x8xf32>
    %51 = arith.addf %41, %50 : vector<256x8xf32>
    %c1_i32_33 = arith.constant 1 : i32
    %52 = arith.addi %0, %c1_i32_33 : i32
    %c0_34 = arith.constant 0 : index
    %53 = arith.index_cast %52 : i32 to index
    %c2_35 = arith.constant 2 : index
    %c0_36 = arith.constant 0 : index
    %54 = vector.load %arg2[%c0_34, %53, %c2_35, %c0_36] : memref<1x18x18x4xf32, #tpu.memory_space<vmem>>, vector<1x16x16x4xf32>
    %55 = vector.shape_cast %54 : vector<1x16x16x4xf32> to vector<16x16x4xf32>
    %56 = vector.shape_cast %55 : vector<16x16x4xf32> to vector<256x4xf32>
    %57 = arith.truncf %56 : vector<256x4xf32> to vector<256x4xbf16>
    %c5 = arith.constant 5 : index
    %c0_37 = arith.constant 0 : index
    %c0_38 = arith.constant 0 : index
    %58 = vector.load %arg3[%c5, %c0_37, %c0_38] : memref<9x4x8xbf16, #tpu.memory_space<vmem>>, vector<1x4x8xbf16>
    %59 = vector.shape_cast %58 : vector<1x4x8xbf16> to vector<4x8xbf16>
    %cst_39 = arith.constant dense<0.000000e+00> : vector<256x8xf32>
    %60 = tpu.matmul %57, %59, %cst_39 {dimension_numbers = #tpu.dot_dimension_numbers<[1], [0], [0], [1], [0, 0, 1, 1], [], []>} : vector<256x4xbf16>, vector<4x8xbf16>, vector<256x8xf32> -> vector<256x8xf32>
    %61 = arith.addf %51, %60 : vector<256x8xf32>
    %c2_i32 = arith.constant 2 : i32
    %62 = arith.addi %0, %c2_i32 : i32
    %c0_40 = arith.constant 0 : index
    %63 = arith.index_cast %62 : i32 to index
    %c0_41 = arith.constant 0 : index
    %c0_42 = arith.constant 0 : index
    %64 = vector.load %arg2[%c0_40, %63, %c0_41, %c0_42] : memref<1x18x18x4xf32, #tpu.memory_space<vmem>>, vector<1x16x16x4xf32>
    %65 = vector.shape_cast %64 : vector<1x16x16x4xf32> to vector<16x16x4xf32>
    %66 = vector.shape_cast %65 : vector<16x16x4xf32> to vector<256x4xf32>
    %67 = arith.truncf %66 : vector<256x4xf32> to vector<256x4xbf16>
    %c6 = arith.constant 6 : index
    %c0_43 = arith.constant 0 : index
    %c0_44 = arith.constant 0 : index
    %68 = vector.load %arg3[%c6, %c0_43, %c0_44] : memref<9x4x8xbf16, #tpu.memory_space<vmem>>, vector<1x4x8xbf16>
    %69 = vector.shape_cast %68 : vector<1x4x8xbf16> to vector<4x8xbf16>
    %cst_45 = arith.constant dense<0.000000e+00> : vector<256x8xf32>
    %70 = tpu.matmul %67, %69, %cst_45 {dimension_numbers = #tpu.dot_dimension_numbers<[1], [0], [0], [1], [0, 0, 1, 1], [], []>} : vector<256x4xbf16>, vector<4x8xbf16>, vector<256x8xf32> -> vector<256x8xf32>
    %71 = arith.addf %61, %70 : vector<256x8xf32>
    %c2_i32_46 = arith.constant 2 : i32
    %72 = arith.addi %0, %c2_i32_46 : i32
    %c0_47 = arith.constant 0 : index
    %73 = arith.index_cast %72 : i32 to index
    %c1_48 = arith.constant 1 : index
    %c0_49 = arith.constant 0 : index
    %74 = vector.load %arg2[%c0_47, %73, %c1_48, %c0_49] : memref<1x18x18x4xf32, #tpu.memory_space<vmem>>, vector<1x16x16x4xf32>
    %75 = vector.shape_cast %74 : vector<1x16x16x4xf32> to vector<16x16x4xf32>
    %76 = vector.shape_cast %75 : vector<16x16x4xf32> to vector<256x4xf32>
    %77 = arith.truncf %76 : vector<256x4xf32> to vector<256x4xbf16>
    %c7 = arith.constant 7 : index
    %c0_50 = arith.constant 0 : index
    %c0_51 = arith.constant 0 : index
    %78 = vector.load %arg3[%c7, %c0_50, %c0_51] : memref<9x4x8xbf16, #tpu.memory_space<vmem>>, vector<1x4x8xbf16>
    %79 = vector.shape_cast %78 : vector<1x4x8xbf16> to vector<4x8xbf16>
    %cst_52 = arith.constant dense<0.000000e+00> : vector<256x8xf32>
    %80 = tpu.matmul %77, %79, %cst_52 {dimension_numbers = #tpu.dot_dimension_numbers<[1], [0], [0], [1], [0, 0, 1, 1], [], []>} : vector<256x4xbf16>, vector<4x8xbf16>, vector<256x8xf32> -> vector<256x8xf32>
    %81 = arith.addf %71, %80 : vector<256x8xf32>
    %c2_i32_53 = arith.constant 2 : i32
    %82 = arith.addi %0, %c2_i32_53 : i32
    %c0_54 = arith.constant 0 : index
    %83 = arith.index_cast %82 : i32 to index
    %c2_55 = arith.constant 2 : index
    %c0_56 = arith.constant 0 : index
    %84 = vector.load %arg2[%c0_54, %83, %c2_55, %c0_56] : memref<1x18x18x4xf32, #tpu.memory_space<vmem>>, vector<1x16x16x4xf32>
    %85 = vector.shape_cast %84 : vector<1x16x16x4xf32> to vector<16x16x4xf32>
    %86 = vector.shape_cast %85 : vector<16x16x4xf32> to vector<256x4xf32>
    %87 = arith.truncf %86 : vector<256x4xf32> to vector<256x4xbf16>
    %c8 = arith.constant 8 : index
    %c0_57 = arith.constant 0 : index
    %c0_58 = arith.constant 0 : index
    %88 = vector.load %arg3[%c8, %c0_57, %c0_58] : memref<9x4x8xbf16, #tpu.memory_space<vmem>>, vector<1x4x8xbf16>
    %89 = vector.shape_cast %88 : vector<1x4x8xbf16> to vector<4x8xbf16>
    %cst_59 = arith.constant dense<0.000000e+00> : vector<256x8xf32>
    %90 = tpu.matmul %87, %89, %cst_59 {dimension_numbers = #tpu.dot_dimension_numbers<[1], [0], [0], [1], [0, 0, 1, 1], [], []>} : vector<256x4xbf16>, vector<4x8xbf16>, vector<256x8xf32> -> vector<256x8xf32>
    %91 = arith.addf %81, %90 : vector<256x8xf32>
    %c0_60 = arith.constant 0 : index
    %c0_61 = arith.constant 0 : index
    %92 = vector.load %arg4[%c0_60, %c0_61] : memref<1x8xf32, #tpu.memory_space<vmem>>, vector<1x8xf32>
    %93 = vector.broadcast %92 : vector<1x8xf32> to vector<256x8xf32>
    %94 = arith.addf %91, %93 : vector<256x8xf32>
    %cst_62 = arith.constant 0.000000e+00 : f32
    %95 = vector.broadcast %cst_62 : f32 to vector<256x8xf32>
    %96 = arith.maximumf %94, %95 : vector<256x8xf32>
    %97 = vector.shape_cast %96 : vector<256x8xf32> to vector<16x16x8xf32>
    %c0_63 = arith.constant 0 : index
    %c0_64 = arith.constant 0 : index
    %c0_65 = arith.constant 0 : index
    %c0_66 = arith.constant 0 : index
    %98 = vector.load %arg5[%c0_63, %c0_64, %c0_65, %c0_66] : memref<1x16x16x8xf32, #tpu.memory_space<vmem>>, vector<1x16x16x8xf32>
    %99 = vector.shape_cast %98 : vector<1x16x16x8xf32> to vector<16x16x8xf32>
    %100 = vector.shape_cast %97 : vector<16x16x8xf32> to vector<1x16x16x8xf32>
    tpu.vector_store %arg5[%c0_63, %c0_64, %c0_65, %c0_66], %100 {strides = array<i32>} : memref<1x16x16x8xf32, #tpu.memory_space<vmem>>, vector<1x16x16x8xf32>,
    return
  }
  func.func @transform_0(%arg0: i32, %arg1: i32) -> (i32, i32, i32, i32) {
    %c0_i32 = arith.constant 0 : i32
    %c0_i32_0 = arith.constant 0 : i32
    %c0_i32_1 = arith.constant 0 : i32
    %c0_i32_2 = arith.constant 0 : i32
    return %arg0, %c0_i32, %c0_i32_0, %c0_i32_1 : i32, i32, i32, i32
  }
  func.func @transform_1(%arg0: i32, %arg1: i32) -> (i32, i32, i32) {
    %c0_i32 = arith.constant 0 : i32
    %c0_i32_0 = arith.constant 0 : i32
    %c0_i32_1 = arith.constant 0 : i32
    %c0_i32_2 = arith.constant 0 : i32
    return %c0_i32, %c0_i32_0, %c0_i32_1 : i32, i32, i32
  }
  func.func @transform_2(%arg0: i32, %arg1: i32) -> (i32, i32) {
    %c0_i32 = arith.constant 0 : i32
    %c0_i32_0 = arith.constant 0 : i32
    %c0_i32_1 = arith.constant 0 : i32
    return %c0_i32, %c0_i32_0 : i32, i32
  }
  func.func @transform_3(%arg0: i32, %arg1: i32) -> (i32, i32, i32, i32) {
    %c0_i32 = arith.constant 0 : i32
    %c0_i32_0 = arith.constant 0 : i32
    %c0_i32_1 = arith.constant 0 : i32
    return %arg0, %arg1, %c0_i32, %c0_i32_0 : i32, i32, i32, i32
  }
}

</mosaic_0001>

<bundles_post_ra>
// kernel: conv_block_forward.1
= control target key start
LH: loop header
LB: loop body
LE: loop exit
PB: predicated region body
PF: predicated region fallthrough
CT: control target
= control target key end

     0   :  { %s2767_s12 = smov 0   ;;  %s2769_s13 = smov 0   ;;  %s3623_s0 = inlined_call_operand.vmem [shape: f32[2,18,18,4], index: 0, kind: input, shape index: {}]   ;;  %s3624_s1 = inlined_call_operand.vmem [shape: bf16[9,4,8], index: 1, kind: input, shape index: {}]   ;;  %s3625_s2 = inlined_call_operand.vmem [shape: f32[1,8], index: 2, kind: input, shape index: {}]   ;;  %s3626_s3 = inlined_call_operand.vmem [shape: f32[2,16,16,8], index: 3, kind: output, shape index: {}]  }
   0x1   :  { %s2771_s14 = smov 0  }
   0x2 LB: > { %s25_s15 = sadd.s32 1, %s2741_s13  ;;  %p2343_p0 = scmp.ge.s32.totalorder %s2745_s14, 1  ;;  %s2745_s14 = sphi %s2771_s14, %s13_s14   ;;  %s2741_s13 = sphi %s2769_s13, %s3670_s13   ;;  %s2737_s12 = sphi %s2767_s12, %s3669_s12  }
   0x3   : > { %p27_p1 = scmp.ge.s32.totalorder %s25_s15, 2  ;;  %p151_p2 = scmp.lt.s32.totalorder %s2745_s14, 3 }
   0x5   : > { %s3672_s15 = smov (%p27_p1, %s25_s15), 0  ;;  %p152_p3 = pnand %p2343_p0, %p151_p2 }
   0x7   : > { %155 = sbr.rel (%p152_p3) target bundleno = 733 (0x2dd), region = 32 }
   0xc   : > { %v2347_v0 = vld [vmem:[%s3624_s1 + $0x2] sm:$0x3]  ;;  %vm348_vm0 = vcmask 1041408   ;;  %p180_p4 = scmp.lt.s32.totalorder %s2737_s12, 1  ;;  %v2380_v2 = vld [vmem:[%s3624_s1 + $0x4] sm:$0x3] }
   0xd   : > { %v350_v1 = vsel %vm348_vm0, %v2347_v0, 0  ;;  %v2429_v3 = vld [vmem:[%s3624_s1 + $0x6] sm:$0x3]  ;;  %v680_v4 = vsel %vm348_vm0, %v2380_v2, 0  ;;  %v248_v6 = vld [vmem:[%s3624_s1] sm:$0x3] }
   0xe   : > { %2694 = vmatpush.bf16.msra.mxu1 %v350_v1  ;;  %2695 = vmatpush.bf16.msra.mxu2 %v350_v1  ;;  %s3674_s12 = smov (!%p180_p4, %s2737_s12), 1  ;;  %v905_v5 = vsel %vm348_vm0, %v2429_v3, 0  ;;  %v490_v7 = vsel %vm348_vm0, %v248_v6, 0  ;;  %v2478_v8 = vld [vmem:[%s3624_s1 + $0x8] sm:$0x3]  ;;  %vm299_vm1 = vcmask 31744  }
   0xf   : > { %2696 = vmatpush.bf16.msra.mxu3 %v350_v1  ;;  %359 = vmatpush.bf16.msra.mxu0 %v350_v1  ;;  %s2697_s26 = smul.u32 432, %s3674_s12  ;;  %v1127_v9 = vsel %vm348_vm0, %v2478_v8, 0  ;;  %v2576_v46 = vld [vmem:[%s3624_s1 + $0xc] sm:$0x3]  ;;  %v2625_v48 = vld [vmem:[%s3624_s1 + $0xe] sm:$0x3] }
  0x10   : > { %v1574_v47 = vsel %vm348_vm0, %v2576_v46, 0  ;;  %v2527_v49 = vld [vmem:[%s3624_s1 + $0xa] sm:$0x3]  ;;  %v1796_v50 = vsel %vm348_vm0, %v2625_v48, 0  ;;  %v2674_v52 = vld [vmem:[%s3624_s1 + $0x10] sm:$0x3] }
  0x11   : > { %s2811_s29 = scalar_lea.vmem %s3623_s0, %s2697_s26  ;;  %v1349_v51 = vsel %vm348_vm0, %v2527_v49, 0  ;;  %v2018_v53 = vsel %vm348_vm0, %v2674_v52, 0  ;;  %s2693_s17 = sshll.u32 %s3674_s12, 8  ;;  %vm2209_vm2 = vcmask 64512  }
  0x12   : > { %689 = vmatpush.bf16.msrb.mxu2 %v680_v4  ;;  %499 = vmatpush.bf16.msrb.mxu1 %v490_v7  ;;  %v257_v10 = vld [vmem:[%s2811_s29 + $0x61] sm:$0xff]  ;;  %v258_v11 = vld [vmem:[%s2811_s29 + $0x69] sm:$0xff]  ;;  %v259_v22 = vld [vmem:[%s2811_s29 + $0x79] sm:$0xff]  ;;  %s3425_s20 = scalar_lea.vmem %s3626_s3, %s2693_s17 }
  0x13   : > { %914 = vmatpush.bf16.msrb.mxu3 %v905_v5  ;;  %1136 = vmatpush.bf16.msrb.mxu0 %v1127_v9  ;;  %v265_v12 = vld [vmem:[%s2811_s29 + $0xc1] sm:$0xff]  ;;  %v2816_v13 = vpack.c.bf16 %v258_v11, %v257_v10  ;;  %v266_v14 = vld [vmem:[%s2811_s29 + $0xc9] sm:$0xff]  ;;  %v267_v24 = vld [vmem:[%s2811_s29 + $0xd9] sm:$0xff] }
  0x14   : > { %v273_v15 = vld [vmem:[%s2811_s29 + $0x121] sm:$0xff]  ;;  %v274_v16 = vld [vmem:[%s2811_s29 + $0x129] sm:$0xff]  ;;  %v2821_v17 = vpack.c.bf16 %v266_v14, %v265_v12  ;;  %v275_v26 = vld [vmem:[%s2811_s29 + $0x139] sm:$0xff] }
  0x15   : > { %v2823_v18 = vpack.c.bf16 %v274_v16, %v273_v15  ;;  %v249_v19 = vld [vmem:[%s2811_s29 + $0x1] sm:$0xff]  ;;  %v250_v20 = vld [vmem:[%s2811_s29 + $0x9] sm:$0xff]  ;;  %2352 = vmatmul.msk.bf16.vlgmr.msra.gmra.mxu1 %vm299_vm1, %v2816_v13  ;;  %v251_v28 = vld [vmem:[%s2811_s29 + $0x19] sm:$0xff] }
  0x16   : > { %v281_v21 = vpack.c.bf16 %v250_v20, %v249_v19  ;;  %2356 = vmatmul.msk.bf16.vlgmr.msra.gmra.mxu2 %vm299_vm1, %v2821_v17  ;;  %v260_v23 = vld [vmem:[%s2811_s29 + $0x81] sm:$0xff]  ;;  %v261_v34 = vld [vmem:[%s2811_s29 + $0x91] sm:$0xff]  ;;  %v262_v35 = vld [vmem:[%s2811_s29 + $0x99] sm:$0xff]  ;;  %1358 = vmatpush.bf16.msra.mxu1 %v1349_v51 }
  0x17   : > { %2360 = vmatmul.msk.bf16.vlgmr.msra.gmra.mxu3 %vm299_vm1, %v2823_v18  ;;  %v268_v25 = vld [vmem:[%s2811_s29 + $0xe1] sm:$0xff]  ;;  %v2842_v30 = vpack.c.bf16 %v260_v23, %v259_v22  ;;  %v269_v36 = vld [vmem:[%s2811_s29 + $0xf1] sm:$0xff]  ;;  %v270_v37 = vld [vmem:[%s2811_s29 + $0xf9] sm:$0xff]  ;;  %v2863_v42 = vpack.c.bf16 %v262_v35, %v261_v34  ;;  %1583 = vmatpush.bf16.msra.mxu2 %v1574_v47 }
  0x18   : > { %2348 = vmatmul.msk.bf16.vlgmr.msra.gmra.mxu0 %vm299_vm1, %v281_v21  ;;  %v276_v27 = vld [vmem:[%s2811_s29 + $0x141] sm:$0xff]  ;;  %v2844_v31 = vpack.c.bf16 %v268_v25, %v267_v24  ;;  %v277_v38 = vld [vmem:[%s2811_s29 + $0x151] sm:$0xff]  ;;  %v278_v39 = vld [vmem:[%s2811_s29 + $0x159] sm:$0xff]  ;;  %v2865_v43 = vpack.c.bf16 %v270_v37, %v269_v36  ;;  %1805 = vmatpush.bf16.msra.mxu3 %v1796_v50 }
  0x19   : > { %v252_v29 = vld [vmem:[%s2811_s29 + $0x21] sm:$0xff]  ;;  %v2846_v32 = vpack.c.bf16 %v276_v27, %v275_v26  ;;  %v253_v40 = vld [vmem:[%s2811_s29 + $0x31] sm:$0xff]  ;;  %v254_v41 = vld [vmem:[%s2811_s29 + $0x39] sm:$0xff]  ;;  %v2867_v44 = vpack.c.bf16 %v278_v39, %v277_v38  ;;  %2027 = vmatpush.bf16.msra.mxu0 %v2018_v53 }
  0x1a   : > { %v282_v33 = vpack.c.bf16 %v252_v29, %v251_v28  ;;  %v2869_v45 = vpack.c.bf16 %v254_v41, %v253_v40  ;;  %v263_v54 = vld [vmem:[%s2811_s29 + $0xa9] sm:$0xff]  ;;  %v264_v55 = vld [vmem:[%s2811_s29 + $0xb1] sm:$0xff]  ;;  %v200_v2 = vld [vmem:[%s2811_s29] sm:$0xff] }
  0x1b   : > { %v271_v56 = vld [vmem:[%s2811_s29 + $0x109] sm:$0xff]  ;;  %v272_v57 = vld [vmem:[%s2811_s29 + $0x111] sm:$0xff]  ;;  %v2903_v62 = vpack.c.bf16 %v264_v55, %v263_v54  ;;  %v2398_v7 = vld [vmem:[%s2811_s29 + $0x20] sm:$0xff] }
  0x1c   : > { %v279_v58 = vld [vmem:[%s2811_s29 + $0x169] sm:$0xff]  ;;  %v280_v59 = vld [vmem:[%s2811_s29 + $0x171] sm:$0xff]  ;;  %v2905_v63 = vpack.c.bf16 %v272_v57, %v271_v56  ;;  %v583_v11 = vld [vmem:[%s2811_s29 + $0x1a] sm:$0xff] }
  0x1d   : > { %v255_v60 = vld [vmem:[%s2811_s29 + $0x49] sm:$0xff]  ;;  %v256_v61 = vld [vmem:[%s2811_s29 + $0x51] sm:$0xff]  ;;  %v2907_v0 = vpack.c.bf16 %v280_v59, %v279_v58  ;;  %v586_v21 = vld [vmem:[%s2811_s29 + $0x3a] sm:$0xff] }
  0x1e   : > { %v2909_v1 = vpack.c.bf16 %v256_v61, %v255_v60  ;;  %v201_v3 = vld [vmem:[%s2811_s29 + $0x8] sm:$0xff]  ;;  %v2397_v6 = vld [vmem:[%s2811_s29 + $0x18] sm:$0xff]  ;;  %v2399_v14 = vld [vmem:[%s2811_s29 + $0x30] sm:$0xff] }
  0x1f   : > { %v581_v4 = vld [vmem:[%s2811_s29 + $0x2] sm:$0xff]  ;;  %v582_v5 = vld [vmem:[%s2811_s29 + $0xa] sm:$0xff]  ;;  %v232_v8 = vpack.c.bf16 %v201_v3, %v200_v2  ;;  %v838_v10 = vpack.c.bf16 %v2398_v7, %v2397_v6  ;;  %v2400_v15 = vld [vmem:[%s2811_s29 + $0x38] sm:$0xff] }
  0x20   : > { %v613_v9 = vpack.c.bf16 %v582_v5, %v581_v4  ;;  %v584_v12 = vld [vmem:[%s2811_s29 + $0x22] sm:$0xff]  ;;  %v2935_v19 = vpack.c.bf16 %v2400_v15, %v2399_v14  ;;  %v585_v20 = vld [vmem:[%s2811_s29 + $0x32] sm:$0xff]  ;;  %v587_v26 = vld [vmem:[%s2811_s29 + $0x4a] sm:$0xff] }
  0x21   : > { %v2933_v16 = vpack.c.bf16 %v584_v12, %v583_v11  ;;  %v2401_v22 = vld [vmem:[%s2811_s29 + $0x48] sm:$0xff]  ;;  %v2402_v23 = vld [vmem:[%s2811_s29 + $0x50] sm:$0xff]  ;;  %v2948_v24 = vpack.c.bf16 %v586_v21, %v585_v20  ;;  %v2403_v28 = vld [vmem:[%s2811_s29 + $0x60] sm:$0xff] }
  0x22   : > { %v2950_v25 = vpack.c.bf16 %v2402_v23, %v2401_v22  ;;  %v588_v27 = vld [vmem:[%s2811_s29 + $0x52] sm:$0xff]  ;;  %v2404_v29 = vld [vmem:[%s2811_s29 + $0x68] sm:$0xff]  ;;  %v2406_v38 = vld [vmem:[%s2811_s29 + $0x80] sm:$0xff] }
  0x23   : > { %v2966_v34 = vpack.c.bf16 %v2404_v29, %v2403_v28  ;;  %v589_v35 = vld [vmem:[%s2811_s29 + $0x62] sm:$0xff]  ;;  %v590_v36 = vld [vmem:[%s2811_s29 + $0x6a] sm:$0xff]  ;;  %v2405_v37 = vld [vmem:[%s2811_s29 + $0x78] sm:$0xff] }
  0x24   : > { %v2982_v40 = vpack.c.bf16 %v590_v36, %v589_v35  ;;  %v2984_v41 = vpack.c.bf16 %v2406_v38, %v2405_v37  ;;  %v591_v50 = vld [vmem:[%s2811_s29 + $0x7a] sm:$0xff]  ;;  %v592_v51 = vld [vmem:[%s2811_s29 + $0x82] sm:$0xff]  ;;  %v2407_v52 = vld [vmem:[%s2811_s29 + $0x90] sm:$0xff] }
  0x25   : > { %2353 = vmatmul.msk.bf16.gmra.mxu1 %vm299_vm1, %v2842_v30  ;;  %v2408_v53 = vld [vmem:[%s2811_s29 + $0x98] sm:$0xff]  ;;  %v3014_v56 = vpack.c.bf16 %v592_v51, %v591_v50  ;;  %v2409_v5 = vld [vmem:[%s2811_s29 + $0xa8] sm:$0xff]  ;;  %v2410_v6 = vld [vmem:[%s2811_s29 + $0xb0] sm:$0xff] }
  0x26   : > { %2357 = vmatmul.msk.bf16.gmra.mxu2 %vm299_vm1, %v2844_v31  ;;  %v3016_v57 = vpack.c.bf16 %v2408_v53, %v2407_v52  ;;  %v593_v3 = vld [vmem:[%s2811_s29 + $0x92] sm:$0xff]  ;;  %v594_v4 = vld [vmem:[%s2811_s29 + $0x9a] sm:$0xff]  ;;  %v595_v21 = vld [vmem:[%s2811_s29 + $0xaa] sm:$0xff] }
  0x27   : > { %2361 = vmatmul.msk.bf16.gmra.mxu3 %vm299_vm1, %v2846_v32  ;;  %v596_v22 = vld [vmem:[%s2811_s29 + $0xb2] sm:$0xff]  ;;  %v2411_v23 = vld [vmem:[%s2811_s29 + $0xc0] sm:$0xff]  ;;  %v598_v53 = vld [vmem:[%s2811_s29 + $0xca] sm:$0xff] }
  0x28   : > { %2349 = vmatmul.msk.bf16.gmra.mxu0 %vm299_vm1, %v282_v33  ;;  %v3078_v29 = vpack.c.bf16 %v596_v22, %v595_v21  ;;  %v597_v52 = vld [vmem:[%s2811_s29 + $0xc2] sm:$0xff] }
  0x29   : > { %v3108_v22 = vpack.c.bf16 %v598_v53, %v597_v52 }
  0x2a   : > { %3639 = vst [vmem:[#allocation8_spill] sm:$0xff] %v3078_v29 }
  0x2b   : > { %3643 = vst [vmem:[#allocation12_spill] sm:$0xff] %v3108_v22 }
  0x35   : > { %2354 = vmatmul.msk.bf16.gmra.mxu1 %vm299_vm1, %v2863_v42 }
  0x36   : > { %2358 = vmatmul.msk.bf16.gmra.mxu2 %vm299_vm1, %v2865_v43 }
  0x37   : > { %2362 = vmatmul.msk.bf16.gmra.mxu3 %vm299_vm1, %v2867_v44 }
  0x38   : > { %2350 = vmatmul.msk.bf16.gmra.mxu0 %vm299_vm1, %v2869_v45 }
  0x45   : > { %2355 = vmatmul.msk.bf16.gmra.mxu1 %vm299_vm1, %v2903_v62 }
  0x46   : > { %2359 = vmatmul.msk.bf16.gmra.mxu2 %vm299_vm1, %v2905_v63 }
  0x47   : > { %2363 = vmatmul.msk.bf16.gmra.mxu3 %vm299_vm1, %v2907_v0 }
  0x48   : > { %2351 = vmatmul.msk.bf16.gmra.mxu0 %vm299_vm1, %v2909_v1 }
  0x55   : > { %2364 = vmatmul.msk.bf16.vlgmr.msrb.gmra.mxu1 %vm299_vm1, %v232_v8 }
  0x56   : > { %2381 = vmatmul.msk.bf16.vlgmr.msrb.gmra.mxu2 %vm299_vm1, %v613_v9  ;;  %v3046_v9 = vpack.c.bf16 %v594_v4, %v593_v3  ;;  %v2413_v3 = vld [vmem:[%s2811_s29 + $0xd8] sm:$0xff]  ;;  %v2414_v4 = vld [vmem:[%s2811_s29 + $0xe0] sm:$0xff] }
  0x57   : > { %2430 = vmatmul.msk.bf16.vlgmr.msrb.gmra.mxu3 %vm299_vm1, %v838_v10 }
  0x58   : > { %2479 = vmatmul.msk.bf16.vlgmr.msrb.gmra.mxu0 %vm299_vm1, %v282_v33  ;;  %v2964_v33 = vpack.c.bf16 %v588_v27, %v587_v26  ;;  %v2412_v26 = vld [vmem:[%s2811_s29 + $0xc8] sm:$0xff] }
  0x59   : > { %v3080_v35 = vpack.c.bf16 %v2412_v26, %v2411_v23 }
  0x5b   : > { %3640 = vst [vmem:[#allocation9_spill] sm:$0xff] %v3080_v35 }
  0x65   : > { %2365 = vmatmul.msk.bf16.gmra.mxu1 %vm299_vm1, %v838_v10  ;;  %v3048_v10 = vpack.c.bf16 %v2410_v6, %v2409_v5 }
  0x66   : > { %2382 = vmatmul.msk.bf16.gmra.mxu2 %vm299_vm1, %v2933_v16 }
  0x67   : > { %2431 = vmatmul.msk.bf16.gmra.mxu3 %vm299_vm1, %v2935_v19  ;;  %3636 = vst [vmem:[#allocation5_spill] sm:$0xff] %v3048_v10 }
  0x68   : > { %2480 = vmatmul.msk.bf16.gmra.mxu0 %vm299_vm1, %v2869_v45 }
  0x75   : > { %2366 = vmatmul.msk.bf16.gmra.mxu1 %vm299_vm1, %v2935_v19 }
  0x76   : > { %2383 = vmatmul.msk.bf16.gmra.mxu2 %vm299_vm1, %v2948_v24 }
  0x77   : > { %2432 = vmatmul.msk.bf16.gmra.mxu3 %vm299_vm1, %v2950_v25 }
  0x78   : > { %2481 = vmatmul.msk.bf16.gmra.mxu0 %vm299_vm1, %v2909_v1 }
  0x85   : > { %2367 = vmatmul.msk.bf16.gmra.mxu1 %vm299_vm1, %v2950_v25 }
  0x86   : > { %2384 = vmatmul.msk.bf16.gmra.mxu2 %vm299_vm1, %v2964_v33 }
  0x87   : > { %2433 = vmatmul.msk.bf16.gmra.mxu3 %vm299_vm1, %v2966_v34 }
  0x88   : > { %2482 = vmatmul.msk.bf16.gmra.mxu0 %vm299_vm1, %v2816_v13 }
  0x92   : > { %v2980_v39 = vpop.f32.mrf.mxu1 }
  0x95   : > { %v2986_v46 = vpop.f32.mrf.mxu0  ;;  %2368 = vmatmul.msk.bf16.gmra.mxu1 %vm299_vm1, %v2966_v34 }
  0x96   : > { %2385 = vmatmul.msk.bf16.gmra.mxu2 %vm299_vm1, %v2982_v40 }
  0x97   : > { %2434 = vmatmul.msk.bf16.gmra.mxu3 %vm299_vm1, %v2984_v41 }
  0x98   : > { %2483 = vmatmul.msk.bf16.gmra.mxu0 %vm299_vm1, %v2842_v30 }
  0x99   : > { %v2996_v13 = vpop.f32.mrf.mxu2 }
  0x9a   : > { %v2998_v47 = vpop.f32.mrf.mxu3  ;;  %v3000_v48 = vpop.f32.mrf.mxu1 }
  0x9d   : > { %v3002_v49 = vpop.f32.mrf.mxu0 }
  0xa1   : > { %v3008_v54 = vpop.f32.mrf.mxu2 }
  0xa2   : > { %v3010_v55 = vpop.f32.mrf.mxu3  ;;  %v3012_v30 = vpop.f32.mrf.mxu1 }
  0xa3   : > { %3633 = vst [vmem:[#allocation2_spill] sm:$0xff] %v3010_v55 }
  0xa5   : > { %v3018_v58 = vpop.f32.mrf.mxu0  ;;  %2369 = vmatmul.msk.bf16.gmra.mxu1 %vm299_vm1, %v2984_v41 }
  0xa6   : > { %2386 = vmatmul.msk.bf16.gmra.mxu2 %vm299_vm1, %v3014_v56 }
  0xa7   : > { %2435 = vmatmul.msk.bf16.gmra.mxu3 %vm299_vm1, %v3016_v57 }
  0xa8   : > { %2484 = vmatmul.msk.bf16.gmra.mxu0 %vm299_vm1, %v2863_v42 }
  0xa9   : > { %v3028_v59 = vpop.f32.mrf.mxu2 }
  0xaa   : > { %v3030_v60 = vpop.f32.mrf.mxu3  ;;  %v3032_v61 = vpop.f32.mrf.mxu1 }
  0xab   : > { %3634 = vst [vmem:[#allocation3_spill] sm:$0xff] %v3030_v60 }
  0xad   : > { %v3034_v2 = vpop.f32.mrf.mxu0 }
  0xb1   : > { %v3040_v7 = vpop.f32.mrf.mxu2 }
  0xb2   : > { %v3042_v8 = vpop.f32.mrf.mxu3  ;;  %v3044_v42 = vpop.f32.mrf.mxu1 }
  0xb3   : > { %3635 = vst [vmem:[#allocation4_spill] sm:$0xff] %v3042_v8 }
  0xb5   : > { %v3050_v11 = vpop.f32.mrf.mxu0  ;;  %2370 = vmatmul.msk.bf16.gmra.mxu1 %vm299_vm1, %v3016_v57 }
  0xb6   : > { %2387 = vmatmul.msk.bf16.gmra.mxu2 %vm299_vm1, %v3046_v9 }
  0xb7   : > { %2436 = vmatmul.msk.bf16.gmra.mxu3 %vm299_vm1, %v3048_v10 }
  0xb8   : > { %2485 = vmatmul.msk.bf16.gmra.mxu0 %vm299_vm1, %v2903_v62 }
  0xb9   : > { %v3060_v12 = vpop.f32.mrf.mxu2 }
  0xba   : > { %v3062_v14 = vpop.f32.mrf.mxu3  ;;  %v3064_v15 = vpop.f32.mrf.mxu1 }
  0xbb   : > { %3637 = vst [vmem:[#allocation6_spill] sm:$0xff] %v3062_v14  ;;  %v600_v14 = vld [vmem:[%s2811_s29 + $0xe2] sm:$0xff] }
  0xbd   : > { %v3066_v20 = vpop.f32.mrf.mxu0 }
  0xc1   : > { %v3072_v27 = vpop.f32.mrf.mxu2 }
  0xc2   : > { %v3074_v28 = vpop.f32.mrf.mxu3  ;;  %v3076_v62 = vpop.f32.mrf.mxu1 }
  0xc3   : > { %3638 = vst [vmem:[#allocation7_spill] sm:$0xff] %v3074_v28 }
  0xc5   : > { %v3082_v36 = vpop.f32.mrf.mxu0  ;;  %2371 = vmatmul.msk.bf16.gmra.mxu1 %vm299_vm1, %v3048_v10 }
  0xc6   : > { %2388 = vmatmul.msk.bf16.gmra.mxu2 %vm299_vm1, %v3078_v29 }
  0xc7   : > { %2437 = vmatmul.msk.bf16.gmra.mxu3 %vm299_vm1, %v3080_v35 }
  0xc8   : > { %2486 = vmatmul.msk.bf16.gmra.mxu0 %vm299_vm1, %v2821_v17  ;;  %v3110_v17 = vpack.c.bf16 %v2414_v4, %v2413_v3 }
  0xc9   : > { %v3092_v37 = vpop.f32.mrf.mxu2 }
  0xca   : > { %v3094_v38 = vpop.f32.mrf.mxu3  ;;  %v3096_v50 = vpop.f32.mrf.mxu1 }
  0xcb   : > { %3641 = vst [vmem:[#allocation10_spill] sm:$0xff] %v3094_v38  ;;  %v599_v38 = vld [vmem:[%s2811_s29 + $0xda] sm:$0xff] }
  0xcc   : > { %v3128_v55 = vpack.c.bf16 %v600_v14, %v599_v38 }
  0xcd   : > { %v3098_v51 = vpop.f32.mrf.mxu0 }
  0xd1   : > { %v3104_v5 = vpop.f32.mrf.mxu2 }
  0xd2   : > { %v3106_v6 = vpop.f32.mrf.mxu3  ;;  %v501_v21 = vpop.f32.mrf.mxu1 }
  0xd3   : > { %3642 = vst [vmem:[#allocation11_spill] sm:$0xff] %v3106_v6  ;;  %v502_v23 = vadd.f32 %v501_v21, %v2986_v46 }
  0xd5   : > { %v1138_v26 = vpop.f32.mrf.mxu0  ;;  %2372 = vmatmul.msk.bf16.gmra.mxu1 %vm299_vm1, %v3080_v35  ;;  %v2415_v35 = vld [vmem:[%s2811_s29 + $0xf0] sm:$0xff] }
  0xd6   : > { %2389 = vmatmul.msk.bf16.gmra.mxu2 %vm299_vm1, %v3108_v22  ;;  %v2416_v22 = vld [vmem:[%s2811_s29 + $0xf8] sm:$0xff] }
  0xd7   : > { %2438 = vmatmul.msk.bf16.gmra.mxu3 %vm299_vm1, %v3110_v17 }
  0xd8   : > { %2487 = vmatmul.msk.bf16.gmra.mxu0 %vm299_vm1, %v2844_v31  ;;  %v3130_v31 = vpack.c.bf16 %v2416_v22, %v2415_v35  ;;  %v601_v22 = vld [vmem:[%s2811_s29 + $0xf2] sm:$0xff] }
  0xd9   : > { %v691_v52 = vpop.f32.mrf.mxu2 }
  0xda   : > { %v916_v53 = vpop.f32.mrf.mxu3  ;;  %v771_v3 = vadd.f32 %v691_v52, %v502_v23  ;;  %v503_v4 = vpop.f32.mrf.mxu1 }
  0xdb   : > { %v504_v46 = vadd.f32 %v503_v4, %v3002_v49  ;;  %v2418_v4 = vld [vmem:[%s2811_s29 + $0x110] sm:$0xff] }
  0xdc   : > { %v996_v21 = vadd.f32 %v916_v53, %v771_v3  ;;  %v602_v53 = vld [vmem:[%s2811_s29 + $0xfa] sm:$0xff]  ;;  %v2417_v3 = vld [vmem:[%s2811_s29 + $0x108] sm:$0xff] }
  0xdd   : > { %v1140_v6 = vpop.f32.mrf.mxu0 }
  0xde   : > { %v3123_v28 = vadd.f32 %v1138_v26, %v996_v21 }
  0xe1   : > { %v693_v8 = vpop.f32.mrf.mxu2 }
  0xe2   : > { %v918_v60 = vpop.f32.mrf.mxu3  ;;  %v772_v29 = vadd.f32 %v693_v8, %v504_v46  ;;  %v506_v10 = vpop.f32.mrf.mxu1 }
  0xe3   : > { %v507_v23 = vadd.f32 %v506_v10, %v3018_v58 }
  0xe4   : > { %v997_v49 = vadd.f32 %v918_v60, %v772_v29 }
  0xe5   : > { %v1143_v52 = vpop.f32.mrf.mxu0  ;;  %2373 = vmatmul.msk.bf16.gmra.mxu1 %vm299_vm1, %v3110_v17 }
  0xe6   : > { %2390 = vmatmul.msk.bf16.gmra.mxu2 %vm299_vm1, %v3128_v55  ;;  %v3139_v8 = vadd.f32 %v1140_v6, %v997_v49 }
  0xe7   : > { %2439 = vmatmul.msk.bf16.gmra.mxu3 %vm299_vm1, %v3130_v31 }
  0xe8   : > { %3644 = vst [vmem:[#allocation13_spill] sm:$0xff] %v3139_v8  ;;  %2488 = vmatmul.msk.bf16.gmra.mxu0 %vm299_vm1, %v2865_v43  ;;  %v3150_v8 = vpack.c.bf16 %v602_v53, %v601_v22  ;;  %v3152_v43 = vpack.c.bf16 %v2418_v4, %v2417_v3  ;;  %v603_v53 = vld [vmem:[%s2811_s29 + $0x10a] sm:$0xff]  ;;  %v604_v4 = vld [vmem:[%s2811_s29 + $0x112] sm:$0xff] }
  0xe9   : > { %v696_v58 = vpop.f32.mrf.mxu2 }
  0xea   : > { %v921_v60 = vpop.f32.mrf.mxu3  ;;  %v773_v10 = vadd.f32 %v696_v58, %v507_v23  ;;  %v508_v14 = vpop.f32.mrf.mxu1 }
  0xeb   : > { %v509_v29 = vadd.f32 %v508_v14, %v3034_v2 }
  0xec   : > { %v998_v35 = vadd.f32 %v921_v60, %v773_v10 }
  0xed   : > { %v1145_v38 = vpop.f32.mrf.mxu0 }
  0xee   : > { %v3145_v26 = vadd.f32 %v1143_v52, %v998_v35 }
  0xf1   : > { %v698_v46 = vpop.f32.mrf.mxu2 }
  0xf2   : > { %v923_v6 = vpop.f32.mrf.mxu3  ;;  %v774_v21 = vadd.f32 %v698_v46, %v509_v29  ;;  %v511_v49 = vpop.f32.mrf.mxu1  ;;  %v2419_v46 = vld [vmem:[%s2811_s29 + $0x120] sm:$0xff] }
  0xf3   : > { %v512_v23 = vadd.f32 %v511_v49, %v3050_v11 }
  0xf4   : > { %v999_v2 = vadd.f32 %v923_v6, %v774_v21  ;;  %v2420_v6 = vld [vmem:[%s2811_s29 + $0x128] sm:$0xff] }
  0xf5   : > { %v1148_v58 = vpop.f32.mrf.mxu0  ;;  %2374 = vmatmul.msk.bf16.gmra.mxu1 %vm299_vm1, %v3130_v31 }
  0xf6   : > { %2391 = vmatmul.msk.bf16.gmra.mxu2 %vm299_vm1, %v3150_v8  ;;  %v3161_v52 = vadd.f32 %v1145_v38, %v999_v2 }
  0xf7   : > { %2440 = vmatmul.msk.bf16.gmra.mxu3 %vm299_vm1, %v3152_v43 }
  0xf8   : > { %3645 = vst [vmem:[#allocation14_spill] sm:$0xff] %v3161_v52  ;;  %2489 = vmatmul.msk.bf16.gmra.mxu0 %vm299_vm1, %v2905_v63  ;;  %v3172_v52 = vpack.c.bf16 %v604_v4, %v603_v53  ;;  %v3174_v63 = vpack.c.bf16 %v2420_v6, %v2419_v46  ;;  %v605_v4 = vld [vmem:[%s2811_s29 + $0x122] sm:$0xff]  ;;  %v606_v6 = vld [vmem:[%s2811_s29 + $0x12a] sm:$0xff] }
  0xf9   : > { %v701_v11 = vpop.f32.mrf.mxu2 }
  0xfa   : > { %v926_v60 = vpop.f32.mrf.mxu3  ;;  %v775_v10 = vadd.f32 %v701_v11, %v512_v23  ;;  %v513_v14 = vpop.f32.mrf.mxu1 }
  0xfb   : > { %v514_v29 = vadd.f32 %v513_v14, %v3066_v20 }
  0xfc   : > { %v1000_v35 = vadd.f32 %v926_v60, %v775_v10 }
  0xfd   : > { %v1150_v22 = vpop.f32.mrf.mxu0 }
  0xfe   : > { %v3167_v3 = vadd.f32 %v1148_v58, %v1000_v35 }
 0x101   : > { %v703_v21 = vpop.f32.mrf.mxu2 }
 0x102   : > { %v928_v38 = vpop.f32.mrf.mxu3  ;;  %v776_v49 = vadd.f32 %v703_v21, %v514_v29  ;;  %v516_v2 = vpop.f32.mrf.mxu1  ;;  %v2421_v21 = vld [vmem:[%s2811_s29 + $0x138] sm:$0xff] }
 0x103   : > { %v517_v23 = vadd.f32 %v516_v2, %v3082_v36 }
 0x104   : > { %v1001_v20 = vadd.f32 %v928_v38, %v776_v49  ;;  %v2422_v38 = vld [vmem:[%s2811_s29 + $0x140] sm:$0xff] }
 0x105   : > { %v1153_v11 = vpop.f32.mrf.mxu0  ;;  %2375 = vmatmul.msk.bf16.gmra.mxu1 %vm299_vm1, %v3152_v43 }
 0x106   : > { %2392 = vmatmul.msk.bf16.gmra.mxu2 %vm299_vm1, %v3172_v52  ;;  %v3183_v58 = vadd.f32 %v1150_v22, %v1001_v20 }
 0x107   : > { %2441 = vmatmul.msk.bf16.gmra.mxu3 %vm299_vm1, %v3174_v63 }
 0x108   : > { %3646 = vst [vmem:[#allocation15_spill] sm:$0xff] %v3183_v58  ;;  %2490 = vmatmul.msk.bf16.gmra.mxu0 %vm299_vm1, %v2823_v18  ;;  %v3194_v58 = vpack.c.bf16 %v606_v6, %v605_v4  ;;  %v3196_v18 = vpack.c.bf16 %v2422_v38, %v2421_v21  ;;  %v607_v6 = vld [vmem:[%s2811_s29 + $0x13a] sm:$0xff]  ;;  %v608_v38 = vld [vmem:[%s2811_s29 + $0x142] sm:$0xff] }
 0x109   : > { %v706_v36 = vpop.f32.mrf.mxu2 }
 0x10a   : > { %v931_v60 = vpop.f32.mrf.mxu3  ;;  %v777_v10 = vadd.f32 %v706_v36, %v517_v23  ;;  %v518_v14 = vpop.f32.mrf.mxu1 }
 0x10b   : > { %v519_v29 = vadd.f32 %v518_v14, %v3098_v51 }
 0x10c   : > { %v1002_v35 = vadd.f32 %v931_v60, %v777_v10 }
 0x10d   : > { %v1155_v53 = vpop.f32.mrf.mxu0 }
 0x10e   : > { %v3189_v46 = vadd.f32 %v1153_v11, %v1002_v35 }
 0x110   : > { %3647 = vst [vmem:[#allocation16_spill] sm:$0xff] %v3189_v46  ;;  %v3216_v46 = vpack.c.bf16 %v608_v38, %v607_v6  ;;  %v609_v6 = vld [vmem:[%s2811_s29 + $0x152] sm:$0xff] }
 0x111   : > { %v708_v49 = vpop.f32.mrf.mxu2 }
 0x112   : > { %v933_v22 = vpop.f32.mrf.mxu3  ;;  %v778_v2 = vadd.f32 %v708_v49, %v519_v29  ;;  %v521_v20 = vpop.f32.mrf.mxu1  ;;  %v2423_v49 = vld [vmem:[%s2811_s29 + $0x150] sm:$0xff] }
 0x113   : > { %v522_v36 = vadd.f32 %v521_v20, %v2980_v39 }
 0x114   : > { %v1003_v23 = vadd.f32 %v933_v22, %v778_v2  ;;  %v2424_v22 = vld [vmem:[%s2811_s29 + $0x158] sm:$0xff] }
 0x115   : > { %v1158_v51 = vpop.f32.mrf.mxu0  ;;  %2376 = vmatmul.msk.bf16.gmra.mxu1 %vm299_vm1, %v3174_v63  ;;  %v3218_v39 = vpack.c.bf16 %v2424_v22, %v2423_v49  ;;  %v610_v49 = vld [vmem:[%s2811_s29 + $0x15a] sm:$0xff]  ;;  %v2425_v22 = vld [vmem:[%s2811_s29 + $0x168] sm:$0xff] }
 0x116   : > { %2393 = vmatmul.msk.bf16.gmra.mxu2 %vm299_vm1, %v3194_v58  ;;  %v3204_v11 = vadd.f32 %v1155_v53, %v1003_v23 }
 0x117   : > { %2442 = vmatmul.msk.bf16.gmra.mxu3 %vm299_vm1, %v3196_v18 }
 0x118   : > { %3648 = vst [vmem:[#allocation17_spill] sm:$0xff] %v3204_v11  ;;  %2491 = vmatmul.msk.bf16.gmra.mxu0 %vm299_vm1, %v2846_v32 }
 0x119   : > { %v711_v60 = vpop.f32.mrf.mxu2 }
 0x11a   : > { %v936_v10 = vpop.f32.mrf.mxu3  ;;  %v779_v14 = vadd.f32 %v711_v60, %v522_v36  ;;  %v523_v29 = vpop.f32.mrf.mxu1 }
 0x11b   : > { %v524_v53 = vadd.f32 %v523_v29, %v3000_v48 }
 0x11c   : > { %v1004_v35 = vadd.f32 %v936_v10, %v779_v14 }
 0x11d   : > { %v1160_v4 = vpop.f32.mrf.mxu0 }
 0x11e   : > { %v3210_v21 = vadd.f32 %v1158_v51, %v1004_v35 }
 0x121   : > { %v713_v2 = vpop.f32.mrf.mxu2 }
 0x122   : > { %v938_v23 = vpop.f32.mrf.mxu3  ;;  %v780_v11 = vadd.f32 %v713_v2, %v524_v53  ;;  %v526_v32 = vpop.f32.mrf.mxu1  ;;  %v2426_v53 = vld [vmem:[%s2811_s29 + $0x170] sm:$0xff] }
 0x123   : > { %v527_v51 = vadd.f32 %v526_v32, %v3012_v30  ;;  %v3240_v30 = vpack.c.bf16 %v2426_v53, %v2425_v22  ;;  %v612_v53 = vld [vmem:[%s2811_s29 + $0x172] sm:$0xff] }
 0x124   : > { %v1005_v20 = vadd.f32 %v938_v23, %v780_v11 }
 0x125   : > { %v1163_v36 = vpop.f32.mrf.mxu0  ;;  %2377 = vmatmul.msk.bf16.gmra.mxu1 %vm299_vm1, %v3196_v18 }
 0x126   : > { %2394 = vmatmul.msk.bf16.gmra.mxu2 %vm299_vm1, %v3216_v46  ;;  %v3226_v48 = vadd.f32 %v1160_v4, %v1005_v20 }
 0x127   : > { %2443 = vmatmul.msk.bf16.gmra.mxu3 %vm299_vm1, %v3218_v39 }
 0x128   : > { %3649 = vst [vmem:[#allocation18_spill] sm:$0xff] %v3226_v48  ;;  %2492 = vmatmul.msk.bf16.gmra.mxu0 %vm299_vm1, %v2867_v44  ;;  %v3238_v48 = vpack.c.bf16 %v610_v49, %v609_v6  ;;  %v611_v49 = vld [vmem:[%s2811_s29 + $0x16a] sm:$0xff] }
 0x129   : > { %v716_v11 = vpop.f32.mrf.mxu2 }
 0x12a   : > { %v941_v60 = vpop.f32.mrf.mxu3  ;;  %v781_v10 = vadd.f32 %v716_v11, %v527_v51  ;;  %v528_v14 = vpop.f32.mrf.mxu1 }
 0x12b   : > { %v529_v4 = vadd.f32 %v528_v14, %v3032_v61 }
 0x12c   : > { %v1006_v29 = vadd.f32 %v941_v60, %v781_v10 }
 0x12d   : > { %v1165_v35 = vpop.f32.mrf.mxu0 }
 0x12e   : > { %v3232_v38 = vadd.f32 %v1163_v36, %v1006_v29 }
 0x131   : > { %v718_v2 = vpop.f32.mrf.mxu2 }
 0x132   : > { %v943_v23 = vpop.f32.mrf.mxu3  ;;  %v782_v20 = vadd.f32 %v718_v2, %v529_v4  ;;  %v531_v44 = vpop.f32.mrf.mxu1  ;;  %v2427_v4 = vld [vmem:[%s2811_s29 + $0x180] sm:$0xff]  ;;  %v2428_v2 = vld [vmem:[%s2811_s29 + $0x188] sm:$0xff] }
 0x133   : > { %v532_v36 = vadd.f32 %v531_v44, %v3044_v42  ;;  %v3262_v44 = vpack.c.bf16 %v612_v53, %v611_v49 }
 0x134   : > { %v1007_v32 = vadd.f32 %v943_v23, %v782_v20  ;;  %v2476_v23 = vld [vmem:[%s2811_s29 + $0x181] sm:$0xff]  ;;  %v2477_v20 = vld [vmem:[%s2811_s29 + $0x189] sm:$0xff] }
 0x135   : > { %v1168_v51 = vpop.f32.mrf.mxu0  ;;  %2378 = vmatmul.msk.bf16.gmra.mxu1 %vm299_vm1, %v3218_v39 }
 0x136   : > { %2395 = vmatmul.msk.bf16.gmra.mxu2 %vm299_vm1, %v3238_v48  ;;  %v3248_v61 = vadd.f32 %v1165_v35, %v1007_v32 }
 0x137   : > { %2444 = vmatmul.msk.bf16.gmra.mxu3 %vm299_vm1, %v3240_v30 }
 0x138   : > { %3650 = vst [vmem:[#allocation19_spill] sm:$0xff] %v3248_v61  ;;  %2493 = vmatmul.msk.bf16.gmra.mxu0 %vm299_vm1, %v2907_v0 }
 0x139   : > { %v721_v11 = vpop.f32.mrf.mxu2 }
 0x13a   : > { %v946_v60 = vpop.f32.mrf.mxu3  ;;  %v783_v10 = vadd.f32 %v721_v11, %v532_v36  ;;  %v533_v14 = vpop.f32.mrf.mxu1  ;;  %v3264_v36 = vpack.c.bf16 %v2428_v2, %v2427_v4  ;;  %v3266_v11 = vpack.c.bf16 %v2477_v20, %v2476_v23 }
 0x13b   : > { %v534_v35 = vadd.f32 %v533_v14, %v3064_v15 }
 0x13c   : > { %v1008_v29 = vadd.f32 %v946_v60, %v783_v10 }
 0x13d   : > { %v1170_v6 = vpop.f32.mrf.mxu0 }
 0x13e   : > { %v3254_v22 = vadd.f32 %v1168_v51, %v1008_v29 }
 0x141   : > { %v723_v32 = vpop.f32.mrf.mxu2 }
 0x142   : > { %v948_v0 = vpop.f32.mrf.mxu3  ;;  %v784_v61 = vadd.f32 %v723_v32, %v534_v35  ;;  %v536_v42 = vpop.f32.mrf.mxu1 }
 0x143   : > { %v537_v10 = vadd.f32 %v536_v42, %v3076_v62 }
 0x144   : > { %v1009_v60 = vadd.f32 %v948_v0, %v784_v61 }
 0x145   : > { %v1173_v51 = vpop.f32.mrf.mxu0  ;;  %2379 = vmatmul.msk.bf16.gmra.mxu1 %vm299_vm1, %v3240_v30 }
 0x146   : > { %2396 = vmatmul.msk.bf16.gmra.mxu2 %vm299_vm1, %v3262_v44  ;;  %v3274_v15 = vadd.f32 %v1170_v6, %v1009_v60 }
 0x147   : > { %2445 = vmatmul.msk.bf16.gmra.mxu3 %vm299_vm1, %v3264_v36 }
 0x148   : > { %2494 = vmatmul.msk.bf16.gmra.mxu0 %vm299_vm1, %v3266_v11 }
 0x149   : > { %v726_v14 = vpop.f32.mrf.mxu2 }
 0x14a   : > { %v951_v29 = vpop.f32.mrf.mxu3  ;;  %v785_v61 = vadd.f32 %v726_v14, %v537_v10  ;;  %v538_v49 = vpop.f32.mrf.mxu1 }
 0x14b   : > { %v539_v35 = vadd.f32 %v538_v49, %v3096_v50 }
 0x14c   : > { %v1010_v53 = vadd.f32 %v951_v29, %v785_v61 }
 0x14d   : > { %v1175_v4 = vpop.f32.mrf.mxu0 }
 0x14e   : > { %v3279_v2 = vadd.f32 %v1173_v51, %v1010_v53 }
 0x151   : > { %v728_v23 = vpop.f32.mrf.mxu2 }
 0x152   : > { %v953_v20 = vpop.f32.mrf.mxu3  ;;  %v786_v32 = vadd.f32 %v728_v23, %v539_v35  ;;  %v541_v6 = vpop.f32.mrf.mxu1 }
 0x153   : > { %v542_v50 = vadd.f32 %v541_v6, %v2996_v13 }
 0x154   : > { %v1011_v0 = vadd.f32 %v953_v20, %v786_v32 }
 0x155   : > { %v1178_v60 = vpop.f32.mrf.mxu0  ;;  %2528 = vmatmul.msk.bf16.vlgmr.msra.gmra.mxu1 %vm299_vm1, %v2933_v16 }
 0x156   : > { %2577 = vmatmul.msk.bf16.vlgmr.msra.gmra.mxu2 %vm299_vm1, %v2935_v19  ;;  %v3288_v62 = vadd.f32 %v1175_v4, %v1011_v0 }
 0x157   : > { %2626 = vmatmul.msk.bf16.vlgmr.msra.gmra.mxu3 %vm299_vm1, %v2869_v45 }
 0x158   : > { %2675 = vmatmul.msk.bf16.vlgmr.msra.gmra.mxu0 %vm299_vm1, %v2948_v24 }
 0x159   : > { %v731_v42 = vpop.f32.mrf.mxu2 }
 0x15a   : > { %v956_v51 = vpop.f32.mrf.mxu3  ;;  %v787_v10 = vadd.f32 %v731_v42, %v542_v50  ;;  %v543_v14 = vpop.f32.mrf.mxu1  ;;  %v2597_v42 = vld [vmem:[%s2811_s29 + $0x61] sm:$0xff] }
 0x15b   : > { %v544_v19 = vadd.f32 %v543_v14, %v3008_v54 }
 0x15c   : > { %v1012_v29 = vadd.f32 %v956_v51, %v787_v10 }
 0x15d   : > { %v1180_v61 = vpop.f32.mrf.mxu0 }
 0x15e   : > { %v3293_v16 = vadd.f32 %v1178_v60, %v1012_v29 }
 0x161   : > { %v733_v49 = vpop.f32.mrf.mxu2 }
 0x162   : > { %v958_v53 = vpop.f32.mrf.mxu3  ;;  %v788_v45 = vadd.f32 %v733_v49, %v544_v19  ;;  %v546_v4 = vpop.f32.mrf.mxu1 }
 0x163   : > { %v547_v54 = vadd.f32 %v546_v4, %v3028_v59 }
 0x164   : > { %v1013_v35 = vadd.f32 %v958_v53, %v788_v45 }
 0x165   : > { %v1183_v23 = vpop.f32.mrf.mxu0  ;;  %2529 = vmatmul.msk.bf16.gmra.mxu1 %vm299_vm1, %v2948_v24 }
 0x166   : > { %2578 = vmatmul.msk.bf16.gmra.mxu2 %vm299_vm1, %v2950_v25  ;;  %v3302_v13 = vadd.f32 %v1180_v61, %v1013_v35  ;;  %v2598_v25 = vld [vmem:[%s2811_s29 + $0x69] sm:$0xff] }
 0x167   : > { %2627 = vmatmul.msk.bf16.gmra.mxu3 %vm299_vm1, %v2909_v1  ;;  %v1731_v61 = vpack.c.bf16 %v2598_v25, %v2597_v42 }
 0x168   : > { %2676 = vmatmul.msk.bf16.gmra.mxu0 %vm299_vm1, %v2964_v33 }
 0x169   : > { %v736_v20 = vpop.f32.mrf.mxu2 }
 0x16a   : > { %v961_v32 = vpop.f32.mrf.mxu3  ;;  %v789_v6 = vadd.f32 %v736_v20, %v547_v54  ;;  %v548_v0 = vpop.f32.mrf.mxu1 }
 0x16b   : > { %v549_v51 = vadd.f32 %v548_v0, %v3040_v7 }
 0x16c   : > { %v1014_v60 = vadd.f32 %v961_v32, %v789_v6  ;;  %v2600_v32 = vld [vmem:[%s2811_s29 + $0x81] sm:$0xff] }
 0x16d   : > { %v1185_v50 = vpop.f32.mrf.mxu0 }
 0x16e   : > { %v3307_v24 = vadd.f32 %v1183_v23, %v1014_v60 }
 0x171   : > { %v738_v1 = vpop.f32.mrf.mxu2 }
 0x172   : > { %v963_v10 = vpop.f32.mrf.mxu3  ;;  %v790_v14 = vadd.f32 %v738_v1, %v549_v51  ;;  %v551_v29 = vpop.f32.mrf.mxu1 }
 0x173   : > { %v552_v7 = vadd.f32 %v551_v29, %v3060_v12 }
 0x174   : > { %v1015_v19 = vadd.f32 %v963_v10, %v790_v14 }
 0x175   : > { %v1188_v59 = vpop.f32.mrf.mxu0  ;;  %2530 = vmatmul.msk.bf16.gmra.mxu1 %vm299_vm1, %v2964_v33  ;;  %v2599_v33 = vld [vmem:[%s2811_s29 + $0x79] sm:$0xff] }
 0x176   : > { %2579 = vmatmul.msk.bf16.gmra.mxu2 %vm299_vm1, %v2966_v34  ;;  %v3317_v49 = vadd.f32 %v1185_v50, %v1015_v19  ;;  %v1732_v42 = vpack.c.bf16 %v2600_v32, %v2599_v33 }
 0x177   : > { %2628 = vmatmul.msk.bf16.gmra.mxu3 %vm299_vm1, %v1731_v61 }
 0x178   : > { %2677 = vmatmul.msk.bf16.gmra.mxu0 %vm299_vm1, %v2982_v40 }
 0x179   : > { %v741_v53 = vpop.f32.mrf.mxu2 }
 0x17a   : > { %v966_v45 = vpop.f32.mrf.mxu3  ;;  %v791_v4 = vadd.f32 %v741_v53, %v552_v7  ;;  %v553_v35 = vpop.f32.mrf.mxu1  ;;  %v2602_v7 = vld [vmem:[%s2811_s29 + $0x99] sm:$0xff] }
 0x17b   : > { %v554_v34 = vadd.f32 %v553_v35, %v3072_v27 }
 0x17c   : > { %v1016_v23 = vadd.f32 %v966_v45, %v791_v4 }
 0x17d   : > { %v1190_v54 = vpop.f32.mrf.mxu0 }
 0x17e   : > { %v3322_v20 = vadd.f32 %v1188_v59, %v1016_v23 }
 0x181   : > { %v743_v6 = vpop.f32.mrf.mxu2 }
 0x182   : > { %v968_v0 = vpop.f32.mrf.mxu3  ;;  %v792_v60 = vadd.f32 %v743_v6, %v554_v34  ;;  %v556_v50 = vpop.f32.mrf.mxu1 }
 0x183   : > { %v557_v27 = vadd.f32 %v556_v50, %v3092_v37 }
 0x184   : > { %v1017_v25 = vadd.f32 %v968_v0, %v792_v60 }
 0x185   : > { %v1193_v12 = vpop.f32.mrf.mxu0  ;;  %2531 = vmatmul.msk.bf16.gmra.mxu1 %vm299_vm1, %v2982_v40  ;;  %v2601_v40 = vld [vmem:[%s2811_s29 + $0x91] sm:$0xff] }
 0x186   : > { %2580 = vmatmul.msk.bf16.gmra.mxu2 %vm299_vm1, %v2984_v41  ;;  %v3332_v51 = vadd.f32 %v1190_v54, %v1017_v25  ;;  %v1733_v23 = vpack.c.bf16 %v2602_v7, %v2601_v40  ;;  %v2604_v25 = vld [vmem:[%s2811_s29 + $0xb1] sm:$0xff] }
 0x187   : > { %2629 = vmatmul.msk.bf16.gmra.mxu3 %vm299_vm1, %v1732_v42  ;;  %v3653_v7 = vld [vmem:[#allocation8_spill] sm:$0xff] }
 0x188   : > { %2678 = vmatmul.msk.bf16.gmra.mxu0 %vm299_vm1, %v3014_v56 }
 0x189   : > { %v746_v1 = vpop.f32.mrf.mxu2 }
 0x18a   : > { %v971_v10 = vpop.f32.mrf.mxu3  ;;  %v793_v14 = vadd.f32 %v746_v1, %v557_v27  ;;  %v558_v29 = vpop.f32.mrf.mxu1 }
 0x18b   : > { %v559_v41 = vadd.f32 %v558_v29, %v3104_v5 }
 0x18c   : > { %v1018_v61 = vadd.f32 %v971_v10, %v793_v14 }
 0x18d   : > { %v1195_v19 = vpop.f32.mrf.mxu0 }
 0x18e   : > { %v3337_v59 = vadd.f32 %v1193_v12, %v1018_v61 }
 0x191   : > { %v748_v53 = vpop.f32.mrf.mxu2 }
 0x192   : > { %v973_v45 = vpop.f32.mrf.mxu3  ;;  %v794_v4 = vadd.f32 %v748_v53, %v559_v41  ;;  %v561_v35 = vpop.f32.mrf.mxu1  ;;  %v3654_v41 = vld [vmem:[#allocation3_spill] sm:$0xff] }
 0x193   : > { %v562_v5 = vadd.f32 %v561_v35, %v2998_v47 }
 0x194   : > { %v1019_v54 = vadd.f32 %v973_v45, %v794_v4 }
 0x195   : > { %v1198_v37 = vpop.f32.mrf.mxu0  ;;  %2532 = vmatmul.msk.bf16.gmra.mxu1 %vm299_vm1, %v3014_v56  ;;  %v2603_v56 = vld [vmem:[%s2811_s29 + $0xa9] sm:$0xff] }
 0x196   : > { %2581 = vmatmul.msk.bf16.gmra.mxu2 %vm299_vm1, %v3016_v57  ;;  %v3347_v33 = vadd.f32 %v1195_v19, %v1019_v54  ;;  %v3651_v57 = vld [vmem:[#allocation2_spill] sm:$0xff]  ;;  %v1734_v29 = vpack.c.bf16 %v2604_v25, %v2603_v56  ;;  %v3652_v19 = vld [vmem:[#allocation5_spill] sm:$0xff] }
 0x197   : > { %2630 = vmatmul.msk.bf16.gmra.mxu3 %vm299_vm1, %v1733_v23 }
 0x198   : > { %2679 = vmatmul.msk.bf16.gmra.mxu0 %vm299_vm1, %v3046_v9 }
 0x199   : > { %v751_v32 = vpop.f32.mrf.mxu2 }
 0x19a   : > { %v976_v34 = vpop.f32.mrf.mxu3  ;;  %v795_v6 = vadd.f32 %v751_v32, %v562_v5  ;;  %v563_v0 = vpop.f32.mrf.mxu1  ;;  %v2606_v32 = vld [vmem:[%s2811_s29 + $0xc9] sm:$0xff] }
 0x19b   : > { %v564_v12 = vadd.f32 %v563_v0, %v3651_v57 }
 0x19c   : > { %v1020_v60 = vadd.f32 %v976_v34, %v795_v6  ;;  %v3655_v34 = vld [vmem:[#allocation4_spill] sm:$0xff] }
 0x19d   : > { %v1200_v50 = vpop.f32.mrf.mxu0 }
 0x19e   : > { %v3352_v42 = vadd.f32 %v1198_v37, %v1020_v60 }
 0x1a1   : > { %v753_v27 = vpop.f32.mrf.mxu2 }
 0x1a2   : > { %v978_v1 = vpop.f32.mrf.mxu3  ;;  %v796_v10 = vadd.f32 %v753_v27, %v564_v12  ;;  %v566_v14 = vpop.f32.mrf.mxu1  ;;  %v3656_v27 = vld [vmem:[#allocation9_spill] sm:$0xff] }
 0x1a3   : > { %v567_v53 = vadd.f32 %v566_v14, %v3654_v41  ;;  %v3658_v14 = vld [vmem:[#allocation6_spill] sm:$0xff] }
 0x1a4   : > { %v1021_v61 = vadd.f32 %v978_v1, %v796_v10  ;;  %v3657_v10 = vld [vmem:[#allocation12_spill] sm:$0xff] }
 0x1a5   : > { %v1203_v47 = vpop.f32.mrf.mxu0  ;;  %2533 = vmatmul.msk.bf16.gmra.mxu1 %vm299_vm1, %v3046_v9  ;;  %v2605_v9 = vld [vmem:[%s2811_s29 + $0xc1] sm:$0xff] }
 0x1a6   : > { %2582 = vmatmul.msk.bf16.gmra.mxu2 %vm299_vm1, %v3652_v19  ;;  %v3362_v40 = vadd.f32 %v1200_v50, %v1021_v61  ;;  %v1735_v25 = vpack.c.bf16 %v2606_v32, %v2605_v9 }
 0x1a7   : > { %2631 = vmatmul.msk.bf16.gmra.mxu3 %vm299_vm1, %v1734_v29 }
 0x1a8   : > { %2680 = vmatmul.msk.bf16.gmra.mxu0 %vm299_vm1, %v3653_v7 }
 0x1a9   : > { %v756_v45 = vpop.f32.mrf.mxu2 }
 0x1aa   : > { %v981_v4 = vpop.f32.mrf.mxu3  ;;  %v797_v35 = vadd.f32 %v756_v45, %v567_v53  ;;  %v568_v23 = vpop.f32.mrf.mxu1 }
 0x1ab   : > { %v569_v6 = vadd.f32 %v568_v23, %v3655_v34  ;;  %v3659_v23 = vld [vmem:[#allocation7_spill] sm:$0xff] }
 0x1ac   : > { %v1022_v54 = vadd.f32 %v981_v4, %v797_v35  ;;  %v2608_v35 = vld [vmem:[%s2811_s29 + $0xe1] sm:$0xff] }
 0x1ad   : > { %v1205_v37 = vpop.f32.mrf.mxu0 }
 0x1ae   : > { %v3367_v5 = vadd.f32 %v1203_v47, %v1022_v54 }
 0x1b1   : > { %v758_v0 = vpop.f32.mrf.mxu2 }
 0x1b2   : > { %v983_v60 = vpop.f32.mrf.mxu3  ;;  %v798_v50 = vadd.f32 %v758_v0, %v569_v6  ;;  %v571_v56 = vpop.f32.mrf.mxu1 }
 0x1b3   : > { %v572_v29 = vadd.f32 %v571_v56, %v3658_v14  ;;  %v3660_v56 = vld [vmem:[#allocation10_spill] sm:$0xff] }
 0x1b4   : > { %v1023_v57 = vadd.f32 %v983_v60, %v798_v50 }
 0x1b5   : > { %v1208_v12 = vpop.f32.mrf.mxu0  ;;  %2534 = vmatmul.msk.bf16.gmra.mxu1 %vm299_vm1, %v3653_v7  ;;  %v2607_v7 = vld [vmem:[%s2811_s29 + $0xd9] sm:$0xff] }
 0x1b6   : > { %2583 = vmatmul.msk.bf16.gmra.mxu2 %vm299_vm1, %v3656_v27  ;;  %v3377_v1 = vadd.f32 %v1205_v37, %v1023_v57  ;;  %v1736_v6 = vpack.c.bf16 %v2608_v35, %v2607_v7 }
 0x1b7   : > { %2632 = vmatmul.msk.bf16.gmra.mxu3 %vm299_vm1, %v1735_v25 }
 0x1b8   : > { %2681 = vmatmul.msk.bf16.gmra.mxu0 %vm299_vm1, %v3657_v10 }
 0x1b9   : > { %v761_v61 = vpop.f32.mrf.mxu2 }
 0x1ba   : > { %v986_v47 = vpop.f32.mrf.mxu3  ;;  %v799_v19 = vadd.f32 %v761_v61, %v572_v29  ;;  %v573_v41 = vpop.f32.mrf.mxu1 }
 0x1bb   : > { %v574_v54 = vadd.f32 %v573_v41, %v3659_v23 }
 0x1bc   : > { %v1024_v53 = vadd.f32 %v986_v47, %v799_v19  ;;  %v2610_v19 = vld [vmem:[%s2811_s29 + $0xf9] sm:$0xff] }
 0x1bd   : > { %v1210_v45 = vpop.f32.mrf.mxu0 }
 0x1be   : > { %v3382_v4 = vadd.f32 %v1208_v12, %v1024_v53 }
 0x1c1   : > { %v763_v9 = vpop.f32.mrf.mxu2 }
 0x1c2   : > { %v988_v37 = vpop.f32.mrf.mxu3  ;;  %v800_v32 = vadd.f32 %v763_v9, %v574_v54  ;;  %v576_v34 = vpop.f32.mrf.mxu1 }
 0x1c3   : > { %v577_v25 = vadd.f32 %v576_v34, %v3660_v56 }
 0x1c4   : > { %v1025_v0 = vadd.f32 %v988_v37, %v800_v32 }
 0x1c5   : > { %v1213_v60 = vpop.f32.mrf.mxu0  ;;  %2535 = vmatmul.msk.bf16.gmra.mxu1 %vm299_vm1, %v3657_v10  ;;  %v2609_v10 = vld [vmem:[%s2811_s29 + $0xf1] sm:$0xff] }
 0x1c6   : > { %2584 = vmatmul.msk.bf16.gmra.mxu2 %vm299_vm1, %v3110_v17  ;;  %v3392_v50 = vadd.f32 %v1210_v45, %v1025_v0  ;;  %v3661_v17 = vld [vmem:[#allocation11_spill] sm:$0xff]  ;;  %v1737_v23 = vpack.c.bf16 %v2610_v19, %v2609_v10 }
 0x1c7   : > { %2633 = vmatmul.msk.bf16.gmra.mxu3 %vm299_vm1, %v1736_v6 }
 0x1c8   : > { %2682 = vmatmul.msk.bf16.gmra.mxu0 %vm299_vm1, %v3128_v55 }
 0x1c9   : > { %v766_v57 = vpop.f32.mrf.mxu2 }
 0x1ca   : > { %v991_v12 = vpop.f32.mrf.mxu3  ;;  %v801_v27 = vadd.f32 %v766_v57, %v577_v25  ;;  %v578_v14 = vpop.f32.mrf.mxu1  ;;  %v2611_v57 = vld [vmem:[%s2811_s29 + $0x109] sm:$0xff] }
 0x1cb   : > { %v579_v41 = vadd.f32 %v578_v14, %v3661_v17  ;;  %v3662_v14 = vld [vmem:[#allocation13_spill] sm:$0xff] }
 0x1cc   : > { %v1026_v29 = vadd.f32 %v991_v12, %v801_v27  ;;  %v2612_v12 = vld [vmem:[%s2811_s29 + $0x111] sm:$0xff] }
 0x1cd   : > { %v1215_v61 = vpop.f32.mrf.mxu0 }
 0x1ce   : > { %v3397_v47 = vadd.f32 %v1213_v60, %v1026_v29 }
 0x1d1   : > { %v768_v53 = vpop.f32.mrf.mxu2 }
 0x1d2   : > { %v993_v45 = vpop.f32.mrf.mxu3  ;;  %v802_v7 = vadd.f32 %v768_v53, %v579_v41  ;;  %v1360_v35 = vpop.f32.mrf.mxu1  ;;  %v1738_v41 = vpack.c.bf16 %v2612_v12, %v2611_v57 }
 0x1d3   : > { %v1440_v32 = vadd.f32 %v1360_v35, %v3123_v28 }
 0x1d4   : > { %v1027_v54 = vadd.f32 %v993_v45, %v802_v7 }
 0x1d5   : > { %v2029_v9 = vpop.f32.mrf.mxu0  ;;  %2536 = vmatmul.msk.bf16.gmra.mxu1 %vm299_vm1, %v3128_v55  ;;  %v3415_v55 = vld [vmem:[%s3625_s2] ss:$0 sm:$0xff] }
 0x1d6   : > { %2585 = vmatmul.msk.bf16.gmra.mxu2 %vm299_vm1, %v3130_v31  ;;  %v3407_v37 = vadd.f32 %v1215_v61, %v1027_v54 }
 0x1d7   : > { %2634 = vmatmul.msk.bf16.gmra.mxu3 %vm299_vm1, %v1737_v23 }
 0x1d8   : > { %2683 = vmatmul.msk.bf16.gmra.mxu0 %vm299_vm1, %v3150_v8 }
 0x1d9   : > { %v1585_v34 = vpop.f32.mrf.mxu2 }
 0x1da   : > { %v1807_v6 = vpop.f32.mrf.mxu3  ;;  %v1665_v0 = vadd.f32 %v1585_v34, %v1440_v32  ;;  %v1362_v60 = vpop.f32.mrf.mxu1 }
 0x1db   : > { %v1441_v29 = vadd.f32 %v1362_v60, %v3662_v14  ;;  %v2613_v60 = vld [vmem:[%s2811_s29 + $0x121] sm:$0xff] }
 0x1dc   : > { %v1887_v56 = vadd.f32 %v1807_v6, %v1665_v0 }
 0x1dd   : > { %v2031_v31 = vpop.f32.mrf.mxu0 }
 0x1de   : > { %v2109_v25 = vadd.f32 %v2029_v9, %v1887_v56  ;;  %v2614_v56 = vld [vmem:[%s2811_s29 + $0x129] sm:$0xff] }
 0x1e0   : > { %v2145_v27 = vadd.f32 %v3415_v55, %v2109_v25  ;;  %v3663_v25 = vld [vmem:[#allocation14_spill] sm:$0xff] }
 0x1e1   : > { %v1587_v28 = vpop.f32.mrf.mxu2 }
 0x1e2   : > { %v1809_v61 = vpop.f32.mrf.mxu3  ;;  %v2177_v10 = vmax.f32 %v2145_v27, 0.0  ;;  %v1666_v19 = vadd.f32 %v1587_v28, %v1441_v29  ;;  %v1365_v17 = vpop.f32.mrf.mxu1  ;;  %v1739_v28 = vpack.c.bf16 %v2614_v56, %v2613_v60 }
 0x1e3   : > { %v1442_v23 = vadd.f32 %v1365_v17, %v3145_v26 }
 0x1e4   : > { %2210 = vst.msk [vmem:[%s3425_s20] sm:$0xff] %vm2209_vm2, %v2177_v10  ;;  %v1888_v53 = vadd.f32 %v1809_v61, %v1666_v19 }
 0x1e5   : > { %v2034_v45 = vpop.f32.mrf.mxu0  ;;  %2537 = vmatmul.msk.bf16.gmra.mxu1 %vm299_vm1, %v3150_v8 }
 0x1e6   : > { %v2110_v7 = vadd.f32 %v2031_v31, %v1888_v53  ;;  %2586 = vmatmul.msk.bf16.gmra.mxu2 %vm299_vm1, %v3152_v43 }
 0x1e7   : > { %2635 = vmatmul.msk.bf16.gmra.mxu3 %vm299_vm1, %v1738_v41 }
 0x1e8   : > { %2684 = vmatmul.msk.bf16.gmra.mxu0 %vm299_vm1, %v3172_v52  ;;  %v2146_v35 = vadd.f32 %v3415_v55, %v2110_v7 }
 0x1e9   : > { %v1590_v54 = vpop.f32.mrf.mxu2 }
 0x1ea   : > { %v1812_v9 = vpop.f32.mrf.mxu3  ;;  %v2178_v32 = vmax.f32 %v2146_v35, 0.0  ;;  %v1667_v34 = vadd.f32 %v1590_v54, %v1442_v23  ;;  %v1367_v8 = vpop.f32.mrf.mxu1 }
 0x1eb   : > { %v1443_v57 = vadd.f32 %v1367_v8, %v3663_v25  ;;  %v3664_v8 = vld [vmem:[#allocation15_spill] sm:$0xff] }
 0x1ec   : > { %2211 = vst.msk [vmem:[%s3425_s20 + $0x8] sm:$0xff] %vm2209_vm2, %v2178_v32  ;;  %v1889_v6 = vadd.f32 %v1812_v9, %v1667_v34  ;;  %v2615_v9 = vld [vmem:[%s2811_s29 + $0x139] sm:$0xff]  ;;  %v2616_v32 = vld [vmem:[%s2811_s29 + $0x141] sm:$0xff] }
 0x1ed   : > { %v2036_v0 = vpop.f32.mrf.mxu0 }
 0x1ee   : > { %v2111_v43 = vadd.f32 %v2034_v45, %v1889_v6 }
 0x1f0   : > { %v2147_v31 = vadd.f32 %v3415_v55, %v2111_v43 }
 0x1f1   : > { %v1592_v12 = vpop.f32.mrf.mxu2 }
 0x1f2   : > { %v1814_v27 = vpop.f32.mrf.mxu3  ;;  %v2179_v26 = vmax.f32 %v2147_v31, 0.0  ;;  %v1668_v14 = vadd.f32 %v1592_v12, %v1443_v57  ;;  %v1370_v29 = vpop.f32.mrf.mxu1  ;;  %v1740_v31 = vpack.c.bf16 %v2616_v32, %v2615_v9 }
 0x1f3   : > { %v1444_v41 = vadd.f32 %v1370_v29, %v3167_v3 }
 0x1f4   : > { %2212 = vst.msk [vmem:[%s3425_s20 + $0x10] sm:$0xff] %vm2209_vm2, %v2179_v26  ;;  %v1890_v61 = vadd.f32 %v1814_v27, %v1668_v14  ;;  %v3665_v26 = vld [vmem:[#allocation16_spill] sm:$0xff] }
 0x1f5   : > { %v2039_v10 = vpop.f32.mrf.mxu0  ;;  %2538 = vmatmul.msk.bf16.gmra.mxu1 %vm299_vm1, %v3172_v52 }
 0x1f6   : > { %v2112_v19 = vadd.f32 %v2036_v0, %v1890_v61  ;;  %2587 = vmatmul.msk.bf16.gmra.mxu2 %vm299_vm1, %v3174_v63 }
 0x1f7   : > { %2636 = vmatmul.msk.bf16.gmra.mxu3 %vm299_vm1, %v1739_v28 }
 0x1f8   : > { %2685 = vmatmul.msk.bf16.gmra.mxu0 %vm299_vm1, %v3194_v58  ;;  %v2148_v17 = vadd.f32 %v3415_v55, %v2112_v19 }
 0x1f9   : > { %v1595_v53 = vpop.f32.mrf.mxu2 }
 0x1fa   : > { %v1817_v45 = vpop.f32.mrf.mxu3  ;;  %v2180_v7 = vmax.f32 %v2148_v17, 0.0  ;;  %v1669_v35 = vadd.f32 %v1595_v53, %v1444_v41  ;;  %v1372_v52 = vpop.f32.mrf.mxu1  ;;  %v2617_v41 = vld [vmem:[%s2811_s29 + $0x151] sm:$0xff]  ;;  %v2618_v53 = vld [vmem:[%s2811_s29 + $0x159] sm:$0xff] }
 0x1fb   : > { %v1445_v6 = vadd.f32 %v1372_v52, %v3664_v8  ;;  %v1741_v32 = vpack.c.bf16 %v2618_v53, %v2617_v41 }
 0x1fc   : > { %2213 = vst.msk [vmem:[%s3425_s20 + $0x18] sm:$0xff] %vm2209_vm2, %v2180_v7  ;;  %v1891_v23 = vadd.f32 %v1817_v45, %v1669_v35  ;;  %v3666_v7 = vld [vmem:[#allocation17_spill] sm:$0xff] }
 0x1fd   : > { %v2041_v54 = vpop.f32.mrf.mxu0 }
 0x1fe   : > { %v2113_v63 = vadd.f32 %v2039_v10, %v1891_v23 }
 0x200   : > { %v2149_v34 = vadd.f32 %v3415_v55, %v2113_v63 }
 0x201   : > { %v1597_v0 = vpop.f32.mrf.mxu2 }
 0x202   : > { %v1819_v43 = vpop.f32.mrf.mxu3  ;;  %v2181_v3 = vmax.f32 %v2149_v34, 0.0  ;;  %v1670_v60 = vadd.f32 %v1597_v0, %v1445_v6  ;;  %v1375_v56 = vpop.f32.mrf.mxu1 }
 0x203   : > { %v1446_v14 = vadd.f32 %v1375_v56, %v3665_v26 }
 0x204   : > { %2214 = vst.msk [vmem:[%s3425_s20 + $0x20] sm:$0xff] %vm2209_vm2, %v2181_v3  ;;  %v1892_v25 = vadd.f32 %v1819_v43, %v1670_v60 }
 0x205   : > { %v2044_v57 = vpop.f32.mrf.mxu0  ;;  %2539 = vmatmul.msk.bf16.gmra.mxu1 %vm299_vm1, %v3194_v58 }
 0x206   : > { %v2114_v12 = vadd.f32 %v2041_v54, %v1892_v25  ;;  %2588 = vmatmul.msk.bf16.gmra.mxu2 %vm299_vm1, %v3196_v18 }
 0x207   : > { %2637 = vmatmul.msk.bf16.gmra.mxu3 %vm299_vm1, %v1740_v31 }
 0x208   : > { %2686 = vmatmul.msk.bf16.gmra.mxu0 %vm299_vm1, %v3216_v46  ;;  %v2150_v27 = vadd.f32 %v3415_v55, %v2114_v12  ;;  %v2619_v12 = vld [vmem:[%s2811_s29 + $0x169] sm:$0xff] }
 0x209   : > { %v1600_v29 = vpop.f32.mrf.mxu2 }
 0x20a   : > { %v1822_v28 = vpop.f32.mrf.mxu3  ;;  %v2182_v61 = vmax.f32 %v2150_v27, 0.0  ;;  %v1671_v10 = vadd.f32 %v1600_v29, %v1446_v14  ;;  %v1377_v58 = vpop.f32.mrf.mxu1  ;;  %v2620_v27 = vld [vmem:[%s2811_s29 + $0x171] sm:$0xff]  ;;  %v3667_v14 = vld [vmem:[#allocation18_spill] sm:$0xff] }
 0x20b   : > { %v1447_v35 = vadd.f32 %v1377_v58, %v3666_v7 }
 0x20c   : > { %2215 = vst.msk [vmem:[%s3425_s20 + $0x28] sm:$0xff] %vm2209_vm2, %v2182_v61  ;;  %v1893_v19 = vadd.f32 %v1822_v28, %v1671_v10 }
 0x20d   : > { %v2046_v17 = vpop.f32.mrf.mxu0 }
 0x20e   : > { %v2115_v18 = vadd.f32 %v2044_v57, %v1893_v19  ;;  %v1742_v19 = vpack.c.bf16 %v2620_v27, %v2619_v12 }
 0x210   : > { %v2151_v45 = vadd.f32 %v3415_v55, %v2115_v18 }
 0x211   : > { %v1602_v52 = vpop.f32.mrf.mxu2 }
 0x212   : > { %v1824_v23 = vpop.f32.mrf.mxu3  ;;  %v2183_v54 = vmax.f32 %v2151_v45, 0.0  ;;  %v1672_v63 = vadd.f32 %v1602_v52, %v1447_v35  ;;  %v1380_v9 = vpop.f32.mrf.mxu1 }
 0x213   : > { %v1448_v43 = vadd.f32 %v1380_v9, %v3210_v21 }
 0x214   : > { %2216 = vst.msk [vmem:[%s3425_s20 + $0x30] sm:$0xff] %vm2209_vm2, %v2183_v54  ;;  %v1894_v34 = vadd.f32 %v1824_v23, %v1672_v63 }
 0x215   : > { %v2049_v8 = vpop.f32.mrf.mxu0  ;;  %2540 = vmatmul.msk.bf16.gmra.mxu1 %vm299_vm1, %v3216_v46 }
 0x216   : > { %v2116_v6 = vadd.f32 %v2046_v17, %v1894_v34  ;;  %2589 = vmatmul.msk.bf16.gmra.mxu2 %vm299_vm1, %v3218_v39 }
 0x217   : > { %2638 = vmatmul.msk.bf16.gmra.mxu3 %vm299_vm1, %v1741_v32  ;;  %v3668_v32 = vld [vmem:[#allocation19_spill] sm:$0xff] }
 0x218   : > { %2687 = vmatmul.msk.bf16.gmra.mxu0 %vm299_vm1, %v3238_v48  ;;  %v2152_v0 = vadd.f32 %v3415_v55, %v2116_v6  ;;  %v2671_v6 = vld [vmem:[%s2811_s29 + $0x18a] sm:$0xff] }
 0x219   : > { %v1605_v3 = vpop.f32.mrf.mxu2 }
 0x21a   : > { %v1827_v60 = vpop.f32.mrf.mxu3  ;;  %v2184_v56 = vmax.f32 %v2152_v0, 0.0  ;;  %v1673_v31 = vadd.f32 %v1605_v3, %v1448_v43  ;;  %v1382_v46 = vpop.f32.mrf.mxu1 }
 0x21b   : > { %v1449_v29 = vadd.f32 %v1382_v46, %v3667_v14 }
 0x21c   : > { %2217 = vst.msk [vmem:[%s3425_s20 + $0x38] sm:$0xff] %vm2209_vm2, %v2184_v56  ;;  %v1895_v25 = vadd.f32 %v1827_v60, %v1673_v31 }
 0x21d   : > { %v2051_v57 = vpop.f32.mrf.mxu0 }
 0x21e   : > { %v2117_v39 = vadd.f32 %v2049_v8, %v1895_v25  ;;  %v2670_v8 = vld [vmem:[%s2811_s29 + $0x182] sm:$0xff] }
 0x21f   : > { %v1965_v56 = vpack.c.bf16 %v2671_v6, %v2670_v8 }
 0x220   : > { %v2153_v26 = vadd.f32 %v3415_v55, %v2117_v39 }
 0x221   : > { %v1607_v28 = vpop.f32.mrf.mxu2 }
 0x222   : > { %v1829_v61 = vpop.f32.mrf.mxu3  ;;  %v2185_v21 = vmax.f32 %v2153_v26, 0.0  ;;  %v1674_v10 = vadd.f32 %v1607_v28, %v1449_v29  ;;  %v1385_v58 = vpop.f32.mrf.mxu1 }
 0x223   : > { %v1450_v45 = vadd.f32 %v1385_v58, %v3232_v38 }
 0x224   : > { %2218 = vst.msk [vmem:[%s3425_s20 + $0x40] sm:$0xff] %vm2209_vm2, %v2185_v21  ;;  %v1896_v17 = vadd.f32 %v1829_v61, %v1674_v10  ;;  %v2575_v61 = vld [vmem:[%s2811_s29 + $0x1a0] sm:$0xff] }
 0x225   : > { %v2054_v18 = vpop.f32.mrf.mxu0  ;;  %2541 = vmatmul.msk.bf16.gmra.mxu1 %vm299_vm1, %v3238_v48  ;;  %v2623_v21 = vld [vmem:[%s2811_s29 + $0x199] sm:$0xff]  ;;  %v2624_v10 = vld [vmem:[%s2811_s29 + $0x1a1] sm:$0xff] }
 0x226   : > { %v2118_v41 = vadd.f32 %v2051_v57, %v1896_v17  ;;  %2590 = vmatmul.msk.bf16.gmra.mxu2 %vm299_vm1, %v3240_v30  ;;  %v2673_v17 = vld [vmem:[%s2811_s29 + $0x1a2] sm:$0xff] }
 0x227   : > { %2639 = vmatmul.msk.bf16.gmra.mxu3 %vm299_vm1, %v1742_v19  ;;  %v2672_v19 = vld [vmem:[%s2811_s29 + $0x19a] sm:$0xff] }
 0x228   : > { %2688 = vmatmul.msk.bf16.gmra.mxu0 %vm299_vm1, %v3262_v44  ;;  %v2154_v53 = vadd.f32 %v3415_v55, %v2118_v41 }
 0x229   : > { %v1610_v7 = vpop.f32.mrf.mxu2 }
 0x22a   : > { %v1832_v35 = vpop.f32.mrf.mxu3  ;;  %v2186_v52 = vmax.f32 %v2154_v53, 0.0  ;;  %v1675_v23 = vadd.f32 %v1610_v7, %v1450_v45  ;;  %v1387_v48 = vpop.f32.mrf.mxu1 }
 0x22b   : > { %v1451_v34 = vadd.f32 %v1387_v48, %v3668_v32 }
 0x22c   : > { %2219 = vst.msk [vmem:[%s3425_s20 + $0x48] sm:$0xff] %vm2209_vm2, %v2186_v52  ;;  %v1897_v30 = vadd.f32 %v1832_v35, %v1675_v23  ;;  %v1744_v52 = vpack.c.bf16 %v2624_v10, %v2623_v21  ;;  %v1966_v23 = vpack.c.bf16 %v2673_v17, %v2672_v19 }
 0x22d   : > { %v2056_v54 = vpop.f32.mrf.mxu0 }
 0x22e   : > { %v2119_v63 = vadd.f32 %v2054_v18, %v1897_v30 }
 0x230   : > { %v2155_v9 = vadd.f32 %v3415_v55, %v2119_v63 }
 0x231   : > { %v1612_v0 = vpop.f32.mrf.mxu2 }
 0x232   : > { %v1834_v43 = vpop.f32.mrf.mxu3  ;;  %v2187_v38 = vmax.f32 %v2155_v9, 0.0  ;;  %v1676_v3 = vadd.f32 %v1612_v0, %v1451_v34  ;;  %v1390_v60 = vpop.f32.mrf.mxu1 }
 0x233   : > { %v1452_v39 = vadd.f32 %v1390_v60, %v3254_v22 }
 0x234   : > { %2220 = vst.msk [vmem:[%s3425_s20 + $0x50] sm:$0xff] %vm2209_vm2, %v2187_v38  ;;  %v1898_v31 = vadd.f32 %v1834_v43, %v1676_v3 }
 0x235   : > { %v2059_v46 = vpop.f32.mrf.mxu0  ;;  %2542 = vmatmul.msk.bf16.gmra.mxu1 %vm299_vm1, %v3262_v44 }
 0x236   : > { %v2120_v25 = vadd.f32 %v2056_v54, %v1898_v31  ;;  %2591 = vmatmul.msk.bf16.gmra.mxu2 %vm299_vm1, %v3264_v36 }
 0x237   : > { %2640 = vmatmul.msk.bf16.gmra.mxu3 %vm299_vm1, %v3266_v11  ;;  %v2574_v11 = vld [vmem:[%s2811_s29 + $0x198] sm:$0xff] }
 0x238   : > { %2689 = vmatmul.msk.bf16.gmra.mxu0 %vm299_vm1, %v1965_v56  ;;  %v2156_v57 = vadd.f32 %v3415_v55, %v2120_v25  ;;  %v1522_v35 = vpack.c.bf16 %v2575_v61, %v2574_v11 }
 0x239   : > { %v1615_v12 = vpop.f32.mrf.mxu2 }
 0x23a   : > { %v1837_v44 = vpop.f32.mrf.mxu3  ;;  %v2188_v27 = vmax.f32 %v2156_v57, 0.0  ;;  %v1677_v26 = vadd.f32 %v1615_v12, %v1452_v39  ;;  %v1392_v14 = vpop.f32.mrf.mxu1 }
 0x23b   : > { %v1453_v22 = vadd.f32 %v1392_v14, %v3274_v15 }
 0x23c   : > { %2221 = vst.msk [vmem:[%s3425_s20 + $0x58] sm:$0xff] %vm2209_vm2, %v2188_v27  ;;  %v1899_v36 = vadd.f32 %v1837_v44, %v1677_v26 }
 0x23d   : > { %v2061_v29 = vpop.f32.mrf.mxu0 }
 0x23e   : > { %v2121_v28 = vadd.f32 %v2059_v46, %v1899_v36 }
 0x240   : > { %v2157_v58 = vadd.f32 %v3415_v55, %v2121_v28 }
 0x241   : > { %v1617_v18 = vpop.f32.mrf.mxu2 }
 0x242   : > { %v1839_v41 = vpop.f32.mrf.mxu3  ;;  %v2189_v53 = vmax.f32 %v2157_v58, 0.0  ;;  %v1678_v45 = vadd.f32 %v1617_v18, %v1453_v22  ;;  %v1395_v7 = vpop.f32.mrf.mxu1 }
 0x243   : > { %v1454_v63 = vadd.f32 %v1395_v7, %v3279_v2 }
 0x244   : > { %2222 = vst.msk [vmem:[%s3425_s20 + $0x60] sm:$0xff] %vm2209_vm2, %v2189_v53  ;;  %v1900_v48 = vadd.f32 %v1839_v41, %v1678_v45 }
 0x245   : > { %v2064_v30 = vpop.f32.mrf.mxu0  ;;  %2543 = vmatmul.msk.bf16.gmra.mxu1 %vm299_vm1, %v1965_v56 }
 0x246   : > { %v2122_v54 = vadd.f32 %v2061_v29, %v1900_v48  ;;  %2592 = vmatmul.msk.bf16.gmra.mxu2 %vm299_vm1, %v1522_v35 }
 0x247   : > { %2641 = vmatmul.msk.bf16.gmra.mxu3 %vm299_vm1, %v1744_v52 }
 0x248   : > { %2690 = vmatmul.msk.bf16.gmra.mxu0 %vm299_vm1, %v1966_v23  ;;  %v2158_v15 = vadd.f32 %v3415_v55, %v2122_v54 }
 0x249   : > { %v1620_v9 = vpop.f32.mrf.mxu2 }
 0x24a   : > { %v1842_v32 = vpop.f32.mrf.mxu3  ;;  %v2190_v34 = vmax.f32 %v2158_v15, 0.0  ;;  %v1679_v8 = vadd.f32 %v1620_v9, %v1454_v63  ;;  %v1397_v6 = vpop.f32.mrf.mxu1 }
 0x24b   : > { %v1455_v60 = vadd.f32 %v1397_v6, %v3288_v62 }
 0x24c   : > { %2223 = vst.msk [vmem:[%s3425_s20 + $0x68] sm:$0xff] %vm2209_vm2, %v2190_v34  ;;  %v1901_v0 = vadd.f32 %v1842_v32, %v1679_v8 }
 0x24d   : > { %v2066_v43 = vpop.f32.mrf.mxu0 }
 0x24e   : > { %v2123_v38 = vadd.f32 %v2064_v30, %v1901_v0 }
 0x250   : > { %v2159_v3 = vadd.f32 %v3415_v55, %v2123_v38 }
 0x251   : > { %v1622_v56 = vpop.f32.mrf.mxu2 }
 0x252   : > { %v1844_v31 = vpop.f32.mrf.mxu3  ;;  %v2191_v46 = vmax.f32 %v2159_v3, 0.0  ;;  %v1680_v2 = vadd.f32 %v1622_v56, %v1455_v60  ;;  %v1400_v25 = vpop.f32.mrf.mxu1 }
 0x253   : > { %v1456_v27 = vadd.f32 %v1400_v25, %v3293_v16 }
 0x254   : > { %2224 = vst.msk [vmem:[%s3425_s20 + $0x70] sm:$0xff] %vm2209_vm2, %v2191_v46  ;;  %v1902_v57 = vadd.f32 %v1844_v31, %v1680_v2 }
 0x255   : > { %v2069_v39 = vpop.f32.mrf.mxu0 }
 0x256   : > { %v2124_v12 = vadd.f32 %v2066_v43, %v1902_v57 }
 0x258   : > { %v2160_v44 = vadd.f32 %v3415_v55, %v2124_v12 }
 0x259   : > { %v1625_v26 = vpop.f32.mrf.mxu2 }
 0x25a   : > { %v1847_v14 = vpop.f32.mrf.mxu3  ;;  %v2192_v36 = vmax.f32 %v2160_v44, 0.0  ;;  %v1681_v62 = vadd.f32 %v1625_v26, %v1456_v27  ;;  %v1402_v29 = vpop.f32.mrf.mxu1 }
 0x25b   : > { %v1457_v10 = vadd.f32 %v1402_v29, %v3302_v13 }
 0x25c   : > { %2225 = vst.msk [vmem:[%s3425_s20 + $0x78] sm:$0xff] %vm2209_vm2, %v2192_v36  ;;  %v1903_v28 = vadd.f32 %v1847_v14, %v1681_v62 }
 0x25d   : > { %v2071_v11 = vpop.f32.mrf.mxu0 }
 0x25e   : > { %v2125_v61 = vadd.f32 %v2069_v39, %v1903_v28 }
 0x260   : > { %v2161_v21 = vadd.f32 %v3415_v55, %v2125_v61 }
 0x261   : > { %v1627_v58 = vpop.f32.mrf.mxu2 }
 0x262   : > { %v1849_v22 = vpop.f32.mrf.mxu3  ;;  %v2193_v19 = vmax.f32 %v2161_v21, 0.0  ;;  %v1682_v16 = vadd.f32 %v1627_v58, %v1457_v10  ;;  %v1405_v17 = vpop.f32.mrf.mxu1 }
 0x263   : > { %v1458_v7 = vadd.f32 %v1405_v17, %v3307_v24 }
 0x264   : > { %2226 = vst.msk [vmem:[%s3425_s20 + $0x80] sm:$0xff] %vm2209_vm2, %v2193_v19  ;;  %v1904_v18 = vadd.f32 %v1849_v22, %v1682_v16 }
 0x265   : > { %v2074_v41 = vpop.f32.mrf.mxu0 }
 0x266   : > { %v2126_v53 = vadd.f32 %v2071_v11, %v1904_v18 }
 0x268   : > { %v2162_v45 = vadd.f32 %v3415_v55, %v2126_v53 }
 0x269   : > { %v1630_v35 = vpop.f32.mrf.mxu2 }
 0x26a   : > { %v1852_v52 = vpop.f32.mrf.mxu3  ;;  %v2194_v23 = vmax.f32 %v2162_v45, 0.0  ;;  %v1683_v13 = vadd.f32 %v1630_v35, %v1458_v7  ;;  %v1407_v48 = vpop.f32.mrf.mxu1 }
 0x26b   : > { %v1459_v9 = vadd.f32 %v1407_v48, %v3317_v49 }
 0x26c   : > { %2227 = vst.msk [vmem:[%s3425_s20 + $0x88] sm:$0xff] %vm2209_vm2, %v2194_v23  ;;  %v1905_v30 = vadd.f32 %v1852_v52, %v1683_v13 }
 0x26d   : > { %v2076_v54 = vpop.f32.mrf.mxu0 }
 0x26e   : > { %v2127_v15 = vadd.f32 %v2074_v41, %v1905_v30 }
 0x270   : > { %v2163_v63 = vadd.f32 %v3415_v55, %v2127_v15 }
 0x271   : > { %v1632_v32 = vpop.f32.mrf.mxu2 }
 0x272   : > { %v1854_v34 = vpop.f32.mrf.mxu3  ;;  %v2195_v8 = vmax.f32 %v2163_v63, 0.0  ;;  %v1684_v24 = vadd.f32 %v1632_v32, %v1459_v9  ;;  %v1410_v6 = vpop.f32.mrf.mxu1 }
 0x273   : > { %v1460_v60 = vadd.f32 %v1410_v6, %v3322_v20 }
 0x274   : > { %2228 = vst.msk [vmem:[%s3425_s20 + $0x90] sm:$0xff] %vm2209_vm2, %v2195_v8  ;;  %v1906_v0 = vadd.f32 %v1854_v34, %v1684_v24 }
 0x275   : > { %v2079_v43 = vpop.f32.mrf.mxu0 }
 0x276   : > { %v2128_v38 = vadd.f32 %v2076_v54, %v1906_v0 }
 0x278   : > { %v2164_v3 = vadd.f32 %v3415_v55, %v2128_v38 }
 0x279   : > { %v1635_v56 = vpop.f32.mrf.mxu2 }
 0x27a   : > { %v1857_v31 = vpop.f32.mrf.mxu3  ;;  %v2196_v46 = vmax.f32 %v2164_v3, 0.0  ;;  %v1685_v49 = vadd.f32 %v1635_v56, %v1460_v60  ;;  %v1412_v2 = vpop.f32.mrf.mxu1 }
 0x27b   : > { %v1461_v44 = vadd.f32 %v1412_v2, %v3332_v51 }
 0x27c   : > { %2229 = vst.msk [vmem:[%s3425_s20 + $0x98] sm:$0xff] %vm2209_vm2, %v2196_v46  ;;  %v1907_v25 = vadd.f32 %v1857_v31, %v1685_v49 }
 0x27d   : > { %v2081_v57 = vpop.f32.mrf.mxu0 }
 0x27e   : > { %v2129_v39 = vadd.f32 %v2079_v43, %v1907_v25 }
 0x280   : > { %v2165_v12 = vadd.f32 %v3415_v55, %v2129_v39 }
 0x281   : > { %v1637_v27 = vpop.f32.mrf.mxu2 }
 0x282   : > { %v1859_v26 = vpop.f32.mrf.mxu3  ;;  %v2197_v14 = vmax.f32 %v2165_v12, 0.0  ;;  %v1686_v20 = vadd.f32 %v1637_v27, %v1461_v44  ;;  %v1415_v36 = vpop.f32.mrf.mxu1 }
 0x283   : > { %v1462_v61 = vadd.f32 %v1415_v36, %v3337_v59 }
 0x284   : > { %2230 = vst.msk [vmem:[%s3425_s20 + $0xa0] sm:$0xff] %vm2209_vm2, %v2197_v14  ;;  %v1908_v62 = vadd.f32 %v1859_v26, %v1686_v20 }
 0x285   : > { %v2084_v29 = vpop.f32.mrf.mxu0 }
 0x286   : > { %v2130_v28 = vadd.f32 %v2081_v57, %v1908_v62 }
 0x288   : > { %v2166_v11 = vadd.f32 %v3415_v55, %v2130_v28 }
 0x289   : > { %v1640_v21 = vpop.f32.mrf.mxu2 }
 0x28a   : > { %v1862_v10 = vpop.f32.mrf.mxu3  ;;  %v2198_v58 = vmax.f32 %v2166_v11, 0.0  ;;  %v1687_v51 = vadd.f32 %v1640_v21, %v1462_v61  ;;  %v1417_v22 = vpop.f32.mrf.mxu1 }
 0x28b   : > { %v1463_v41 = vadd.f32 %v1417_v22, %v3347_v33 }
 0x28c   : > { %2231 = vst.msk [vmem:[%s3425_s20 + $0xa8] sm:$0xff] %vm2209_vm2, %v2198_v58  ;;  %v1909_v19 = vadd.f32 %v1862_v10, %v1687_v51 }
 0x28d   : > { %v2086_v16 = vpop.f32.mrf.mxu0 }
 0x28e   : > { %v2131_v17 = vadd.f32 %v2084_v29, %v1909_v19 }
 0x290   : > { %v2167_v18 = vadd.f32 %v3415_v55, %v2131_v17 }
 0x291   : > { %v1642_v53 = vpop.f32.mrf.mxu2 }
 0x292   : > { %v1864_v45 = vpop.f32.mrf.mxu3  ;;  %v2199_v7 = vmax.f32 %v2167_v18, 0.0  ;;  %v1688_v59 = vadd.f32 %v1642_v53, %v1463_v41  ;;  %v1420_v35 = vpop.f32.mrf.mxu1 }
 0x293   : > { %v1464_v30 = vadd.f32 %v1420_v35, %v3352_v42 }
 0x294   : > { %2232 = vst.msk [vmem:[%s3425_s20 + $0xb0] sm:$0xff] %vm2209_vm2, %v2199_v7  ;;  %v1910_v52 = vadd.f32 %v1864_v45, %v1688_v59 }
 0x295   : > { %v2089_v23 = vpop.f32.mrf.mxu0 }
 0x296   : > { %v2132_v13 = vadd.f32 %v2086_v16, %v1910_v52 }
 0x298   : > { %v2168_v48 = vadd.f32 %v3415_v55, %v2132_v13 }
 0x299   : > { %v1645_v54 = vpop.f32.mrf.mxu2 }
 0x29a   : > { %v1867_v15 = vpop.f32.mrf.mxu3  ;;  %v2200_v63 = vmax.f32 %v2168_v48, 0.0  ;;  %v1689_v33 = vadd.f32 %v1645_v54, %v1464_v30  ;;  %v1422_v9 = vpop.f32.mrf.mxu1 }
 0x29b   : > { %v1465_v6 = vadd.f32 %v1422_v9, %v3362_v40 }
 0x29c   : > { %2233 = vst.msk [vmem:[%s3425_s20 + $0xb8] sm:$0xff] %vm2209_vm2, %v2200_v63  ;;  %v1911_v32 = vadd.f32 %v1867_v15, %v1689_v33 }
 0x29d   : > { %v2091_v34 = vpop.f32.mrf.mxu0 }
 0x29e   : > { %v2133_v8 = vadd.f32 %v2089_v23, %v1911_v32 }
 0x2a0   : > { %v2169_v24 = vadd.f32 %v3415_v55, %v2133_v8 }
 0x2a1   : > { %v1647_v0 = vpop.f32.mrf.mxu2 }
 0x2a2   : > { %v1869_v43 = vpop.f32.mrf.mxu3  ;;  %v2201_v38 = vmax.f32 %v2169_v24, 0.0  ;;  %v1690_v42 = vadd.f32 %v1647_v0, %v1465_v6  ;;  %v1425_v3 = vpop.f32.mrf.mxu1 }
 0x2a3   : > { %v1466_v49 = vadd.f32 %v1425_v3, %v3367_v5 }
 0x2a4   : > { %2234 = vst.msk [vmem:[%s3425_s20 + $0xc0] sm:$0xff] %vm2209_vm2, %v2201_v38  ;;  %v1912_v60 = vadd.f32 %v1869_v43, %v1690_v42 }
 0x2a5   : > { %v2094_v56 = vpop.f32.mrf.mxu0 }
 0x2a6   : > { %v2134_v31 = vadd.f32 %v2091_v34, %v1912_v60 }
 0x2a8   : > { %v2170_v46 = vadd.f32 %v3415_v55, %v2134_v31 }
 0x2a9   : > { %v1650_v2 = vpop.f32.mrf.mxu2 }
 0x2aa   : > { %v1872_v25 = vpop.f32.mrf.mxu3  ;;  %v2202_v57 = vmax.f32 %v2170_v46, 0.0  ;;  %v1691_v40 = vadd.f32 %v1650_v2, %v1466_v49  ;;  %v1427_v39 = vpop.f32.mrf.mxu1 }
 0x2ab   : > { %v1467_v14 = vadd.f32 %v1427_v39, %v3377_v1 }
 0x2ac   : > { %2235 = vst.msk [vmem:[%s3425_s20 + $0xc8] sm:$0xff] %vm2209_vm2, %v2202_v57  ;;  %v1913_v12 = vadd.f32 %v1872_v25, %v1691_v40 }
 0x2ad   : > { %v2096_v44 = vpop.f32.mrf.mxu0 }
 0x2ae   : > { %v2135_v27 = vadd.f32 %v2094_v56, %v1913_v12 }
 0x2b0   : > { %v2171_v26 = vadd.f32 %v3415_v55, %v2135_v27 }
 0x2b1   : > { %v1652_v20 = vpop.f32.mrf.mxu2 }
 0x2b2   : > { %v1874_v36 = vpop.f32.mrf.mxu3  ;;  %v2203_v62 = vmax.f32 %v2171_v26, 0.0  ;;  %v1692_v5 = vadd.f32 %v1652_v20, %v1467_v14  ;;  %v1430_v29 = vpop.f32.mrf.mxu1 }
 0x2b3   : > { %v1468_v10 = vadd.f32 %v1430_v29, %v3382_v4 }
 0x2b4   : > { %2236 = vst.msk [vmem:[%s3425_s20 + $0xd0] sm:$0xff] %vm2209_vm2, %v2203_v62  ;;  %v1914_v28 = vadd.f32 %v1874_v36, %v1692_v5 }
 0x2b5   : > { %v2099_v61 = vpop.f32.mrf.mxu0 }
 0x2b6   : > { %v2136_v11 = vadd.f32 %v2096_v44, %v1914_v28 }
 0x2b8   : > { %v2172_v21 = vadd.f32 %v3415_v55, %v2136_v11 }
 0x2b9   : > { %v1655_v58 = vpop.f32.mrf.mxu2 }
 0x2ba   : > { %v1877_v51 = vpop.f32.mrf.mxu3  ;;  %v2204_v22 = vmax.f32 %v2172_v21, 0.0  ;;  %v1693_v1 = vadd.f32 %v1655_v58, %v1468_v10  ;;  %v1432_v19 = vpop.f32.mrf.mxu1 }
 0x2bb   : > { %v1469_v41 = vadd.f32 %v1432_v19, %v3392_v50 }
 0x2bc   : > { %2237 = vst.msk [vmem:[%s3425_s20 + $0xd8] sm:$0xff] %vm2209_vm2, %v2204_v22  ;;  %v1915_v16 = vadd.f32 %v1877_v51, %v1693_v1 }
 0x2bd   : > { %v2101_v53 = vpop.f32.mrf.mxu0 }
 0x2be   : > { %v2137_v17 = vadd.f32 %v2099_v61, %v1915_v16 }
 0x2c0   : > { %v2173_v18 = vadd.f32 %v3415_v55, %v2137_v17 }
 0x2c1   : > { %v1657_v45 = vpop.f32.mrf.mxu2 }
 0x2c2   : > { %v1879_v7 = vpop.f32.mrf.mxu3  ;;  %v2205_v59 = vmax.f32 %v2173_v18, 0.0  ;;  %v1694_v4 = vadd.f32 %v1657_v45, %v1469_v41  ;;  %v1435_v35 = vpop.f32.mrf.mxu1 }
 0x2c3   : > { %v1470_v48 = vadd.f32 %v1435_v35, %v3397_v47 }
 0x2c4   : > { %2238 = vst.msk [vmem:[%s3425_s20 + $0xe0] sm:$0xff] %vm2209_vm2, %v2205_v59  ;;  %v1916_v52 = vadd.f32 %v1879_v7, %v1694_v4 }
 0x2c5   : > { %v2104_v63 = vpop.f32.mrf.mxu0 }
 0x2c6   : > { %v2138_v23 = vadd.f32 %v2101_v53, %v1916_v52 }
 0x2c8   : > { %v2174_v13 = vadd.f32 %v3415_v55, %v2138_v23 }
 0x2c9   : > { %v1660_v30 = vpop.f32.mrf.mxu2 }
 0x2ca   : > { %v1882_v54 = vpop.f32.mrf.mxu3  ;;  %v2206_v15 = vmax.f32 %v2174_v13, 0.0  ;;  %v1695_v50 = vadd.f32 %v1660_v30, %v1470_v48  ;;  %v1437_v9 = vpop.f32.mrf.mxu1 }
 0x2cb   : > { %v1471_v8 = vadd.f32 %v1437_v9, %v3407_v37 }
 0x2cc   : > { %2239 = vst.msk [vmem:[%s3425_s20 + $0xe8] sm:$0xff] %vm2209_vm2, %v2206_v15  ;;  %v1917_v33 = vadd.f32 %v1882_v54, %v1695_v50 }
 0x2cd   : > { %v2106_v38 = vpop.f32.mrf.mxu0 }
 0x2ce   : > { %v2139_v32 = vadd.f32 %v2104_v63, %v1917_v33 }
 0x2d0   : > { %v2175_v34 = vadd.f32 %v3415_v55, %v2139_v32 }
 0x2d1   : > { %v1662_v24 = vpop.f32.mrf.mxu2 }
 0x2d2   : > { %v2207_v6 = vmax.f32 %v2175_v34, 0.0  ;;  %v1696_v0 = vadd.f32 %v1662_v24, %v1471_v8  ;;  %v1884_v47 = vpop.f32.mrf.mxu3 }
 0x2d4   : > { %2240 = vst.msk [vmem:[%s3425_s20 + $0xf0] sm:$0xff] %vm2209_vm2, %v2207_v6  ;;  %v1918_v43 = vadd.f32 %v1884_v47, %v1696_v0 }
 0x2d6   : > { %v2140_v42 = vadd.f32 %v2106_v38, %v1918_v43 }
 0x2d8   : > { %v2176_v3 = vadd.f32 %v3415_v55, %v2140_v42 }
 0x2da   : > { %v2208_v60 = vmax.f32 %v2176_v3, 0.0 }
 0x2dc   : > { %2241 = vst.msk [vmem:[%s3425_s20 + $0xf8] sm:$0xff] %vm2209_vm2, %v2208_v60 }
 0x2dd PF: > { %s13_s14 = sadd.s32 1, %s2745_s14   ;;  %s3669_s12 = smov %s2741_s13 }
 0x2de   : > { %p10_p5 = scmp.ge.s32.totalorder %s13_s14, 4   ;;  %s3670_s13 = smov %s3672_s15 }
 0x2e0   :  { %12 = sbr.rel (!%p10_p5) target bundleno = 2 (0x2), region = 73 }

</bundles_post_ra>
